<compile_context>
chip_gen: v6e
topology: v6e:2x2x1
jax: 0.10.0
libtpu: 0.0.40
codegen_flags: <defaults>
</compile_context>

<pallas_src>
import math
import functools

import jax
import jax.numpy as jnp
from jax.experimental import pallas as pl
from jax.experimental.pallas import tpu as pltpu


# ----------------------------------------------------------------------------
# helpers
# ----------------------------------------------------------------------------

def _round_up(x, m):
    return (x + m - 1) // m * m


def _tile(dim, target):
    """Largest 'nice' tile that exactly divides dim (falls back to the full dim)."""
    for t in (target, target // 2, target // 4, 128, 64):
        if 0 < t <= dim and dim % t == 0:
            return t
    return dim


def _gelu(x):
    # TODO(synk): PyTorch nn.GELU() is the exact erf GELU; tanh approximation used here
    # (|diff| ~ 1e-3) to guarantee clean Mosaic lowering.
    return 0.5 * x * (1.0 + jnp.tanh(math.sqrt(2.0 / math.pi) * (x + 0.044715 * x * x * x)))


# ----------------------------------------------------------------------------
# LayerNorm kernel (tiled over tokens)
# ----------------------------------------------------------------------------

def _layernorm_kernel(x_ref, g_ref, b_ref, o_ref):
    x = x_ref[...].astype(jnp.float32)                       # (bm, D)
    mean = jnp.mean(x, axis=-1, keepdims=True)
    var = jnp.mean(jnp.square(x - mean), axis=-1, keepdims=True)
    y = (x - mean) * jax.lax.rsqrt(var + 1e-5)
    o_ref[...] = (y * g_ref[...].astype(jnp.float32)
                  + b_ref[...].astype(jnp.float32)).astype(o_ref.dtype)


def layernorm(x, g, b, *, tm=512):
    lead, d = x.shape[:-1], x.shape[-1]
    x2 = x.reshape(-1, d)
    m = x2.shape[0]
    bm = _tile(m, tm)
    out = pl.pallas_call(
        _layernorm_kernel,
        grid=(m // bm,),
        out_shape=jax.ShapeDtypeStruct((m, d), x.dtype),
        in_specs=[pl.BlockSpec((bm, d), lambda i: (i, 0)),
                  pl.BlockSpec((1, d), lambda i: (0, 0)),
                  pl.BlockSpec((1, d), lambda i: (0, 0))],
        out_specs=pl.BlockSpec((bm, d), lambda i: (i, 0)),
        compiler_params=pltpu.CompilerParams(dimension_semantics=("parallel",)),
    )(x2, g.reshape(1, d), b.reshape(1, d))
    return out.reshape(*lead, d)


# ----------------------------------------------------------------------------
# Tiled Linear kernel with fused bias / GELU / residual epilogue
# ----------------------------------------------------------------------------

def _make_matmul_kernel(activation, has_residual):
    def kernel(*refs):
        if has_residual:
            x_ref, w_ref, b_ref, r_ref, o_ref, acc_ref = refs
        else:
            x_ref, w_ref, b_ref, o_ref, acc_ref = refs
            r_ref = None
        k = pl.program_id(2)

        @pl.when(k == 0)
        def _():
            acc_ref[...] = jnp.zeros_like(acc_ref)

        # Native-dtype operands straight to the MXU, f32 accumulation.
        acc_ref[...] += jnp.dot(x_ref[...], w_ref[...],
                                preferred_element_type=jnp.float32)

        @pl.when(k == pl.num_programs(2) - 1)
        def _():
            y = acc_ref[...] + b_ref[...].astype(jnp.float32)
            if activation == "gelu":
                y = _gelu(y)
            if r_ref is not None:
                y = y + r_ref[...].astype(jnp.float32)       # fused residual add
            o_ref[...] = y.astype(o_ref.dtype)

    return kernel


def linear(x, w, b, *, activation=None, residual=None, tm=256, tn=256, tk=512):
    """y = act(x @ w + b) (+ residual). Tiled (M, N, K) grid with f32 VMEM accumulator."""
    lead, kd = x.shape[:-1], x.shape[-1]
    n = w.shape[-1]
    x2 = x.reshape(-1, kd)
    m = x2.shape[0]

    # Lane-pad narrow / misaligned N so output stores are dense 128-lane vst's.
    # (No-op for realistic GPT widths that are already multiples of 128.)
    n_pad = _round_up(n, 128)
    if n_pad != n:
        w = jnp.pad(w, ((0, 0), (0, n_pad - n)))
        b = jnp.pad(b, (0, n_pad - n))

    r2 = None
    if residual is not None:
        r2 = residual.reshape(-1, n)
        if n_pad != n:
            r2 = jnp.pad(r2, ((0, 0), (0, n_pad - n)))

    bm, bn, bk = _tile(m, tm), _tile(n_pad, tn), _tile(kd, tk)
    grid = (m // bm, n_pad // bn, kd // bk)

    in_specs = [pl.BlockSpec((bm, bk), lambda i, j, kk: (i, kk)),
                pl.BlockSpec((bk, bn), lambda i, j, kk: (kk, j)),
                pl.BlockSpec((1, bn), lambda i, j, kk: (0, j))]
    operands = [x2, w, b.reshape(1, n_pad)]
    if r2 is not None:
        in_specs.append(pl.BlockSpec((bm, bn), lambda i, j, kk: (i, j)))
        operands.append(r2)

    out = pl.pallas_call(
        _make_matmul_kernel(activation, r2 is not None),
        grid=grid,
        out_shape=jax.ShapeDtypeStruct((m, n_pad), x.dtype),
        in_specs=in_specs,
        out_specs=pl.BlockSpec((bm, bn), lambda i, j, kk: (i, j)),
        scratch_shapes=[pltpu.VMEM((bm, bn), jnp.float32)],
        compiler_params=pltpu.CompilerParams(
            dimension_semantics=("parallel", "parallel", "arbitrary")),
    )(*operands)

    if n_pad != n:
        out = out[:, :n]
    return out.reshape(*lead, n)


# ----------------------------------------------------------------------------
# Fused causal self-attention (all heads of one batch element per grid step)
# ----------------------------------------------------------------------------

def _attn_body(q_ref, k_ref, v_ref, scale):
    q, k, v = q_ref[...], k_ref[...], v_ref[...]             # (H, T, hd), native dtype -> MXU
    s = jnp.einsum('hqd,hkd->hqk', q, k,
                   preferred_element_type=jnp.float32) * scale
    row = jax.lax.broadcasted_iota(jnp.int32, s.shape, 1)
    col = jax.lax.broadcasted_iota(jnp.int32, s.shape, 2)
    s = jnp.where(col <= row, s, -1e30)                      # causal mask (n_unmasked=0); f32 path
    s = s - jnp.max(s, axis=-1, keepdims=True)
    e = jnp.exp(s)
    p = e * pl.reciprocal(jnp.sum(e, axis=-1, keepdims=True), approx=True)
    y = jnp.einsum('hqk,hkd->hqd', p.astype(v.dtype), v,
                   preferred_element_type=jnp.float32)
    return p, y


def _attn_kernel(q_ref, k_ref, v_ref, o_ref, *, scale):
    _, y = _attn_body(q_ref, k_ref, v_ref, scale)
    o_ref[...] = y.astype(o_ref.dtype)


def _attn_att_kernel(q_ref, k_ref, v_ref, o_ref, att_ref, *, scale):
    p, y = _attn_body(q_ref, k_ref, v_ref, scale)
    o_ref[...] = y.astype(o_ref.dtype)
    att_ref[...] = p.astype(att_ref.dtype)


def causal_attention(q, k, v, n_head, *, emit_att):
    """q, k, v: (B*H, T, hd). Returns (y, att) with att=None unless emit_att."""
    bh, t, hd = q.shape
    nb = bh // n_head
    scale = 1.0 / math.sqrt(hd)
    # TODO(synk): for long block_size, tile flash-style over the KV axis instead of
    # materializing the full (H, T, T) score matrix per batch element.
    qkv_spec = pl.BlockSpec((n_head, t, hd), lambda i: (i, 0, 0))
    o_spec = pl.BlockSpec((n_head, t, hd), lambda i: (i, 0, 0))

    if emit_att:
        out_shape = (jax.ShapeDtypeStruct((bh, t, hd), q.dtype),
                     jax.ShapeDtypeStruct((bh, t, t), q.dtype))
        out_specs = (o_spec, pl.BlockSpec((n_head, t, t), lambda i: (i, 0, 0)))
        kernel = functools.partial(_attn_att_kernel, scale=scale)
    else:
        out_shape = jax.ShapeDtypeStruct((bh, t, hd), q.dtype)
        out_specs = o_spec
        kernel = functools.partial(_attn_kernel, scale=scale)

    res = pl.pallas_call(
        kernel,
        grid=(nb,),
        out_shape=out_shape,
        in_specs=[qkv_spec, qkv_spec, qkv_spec],
        out_specs=out_specs,
        compiler_params=pltpu.CompilerParams(dimension_semantics=("parallel",)),
    )(q, k, v)

    if emit_att:
        return res[0], res[1]
    return res, None


# ----------------------------------------------------------------------------
# GPT transformer forward (glue around the Pallas kernels)
# ----------------------------------------------------------------------------

def gpt_forward(params, idx, args):
    """idx: (B, T) int32 tokens.  Returns (logits, None, att_last_block)."""
    B, T = idx.shape
    C, H = args["n_embd"], args["n_head"]
    hd = C // H
    n_layer = len(params["blocks"])

    tok = jnp.take(params["tok_emb"], idx, axis=0)           # (B, T, C) embedding lookup (glue)
    pos = params["pos_emb"][:, :T, :]                        # (1, T, C)
    x = tok + pos                                            # embd dropout = 0.0

    def split_heads(t):
        return t.reshape(B, T, H, hd).transpose(0, 2, 1, 3).reshape(B * H, T, hd)

    att_last = None
    for li, blk in enumerate(params["blocks"]):
        # --- causal self-attention sub-block ---
        h = layernorm(x, blk["ln1_g"], blk["ln1_b"])
        qkv = linear(h, blk["attn_w"], blk["attn_b"])        # (B, T, 3C)
        q, k, v = jnp.split(qkv, 3, axis=-1)
        emit_att = (li == n_layer - 1)                       # only the last block's att is returned
        y, att = causal_attention(split_heads(q), split_heads(k), split_heads(v),
                                  H, emit_att=emit_att)
        if att is not None:
            att_last = att.reshape(B, H, T, T)
        y = y.reshape(B, H, T, hd).transpose(0, 2, 1, 3).reshape(B, T, C)
        x = linear(y, blk["proj_w"], blk["proj_b"], residual=x)   # fused residual; resid drop=0.0

        # --- MLP sub-block (two pipelined matmuls; GELU + residual fused in epilogues) ---
        h = layernorm(x, blk["ln2_g"], blk["ln2_b"])
        h = linear(h, blk["fc_w"], blk["fc_b"], activation="gelu")
        x = linear(h, blk["proj2_w"], blk["proj2_b"], residual=x)

    x = layernorm(x, params["lnf_g"], params["lnf_b"])
    logits = linear(x, params["head_w"], params["head_b"])   # (B, T, last_linear)
    return logits, None, att_last


def gpt_encoder_forward(params, idx, args):
    """Matches GPTEncoder.forward: returns (mean, logvar, att)."""
    logits, _, att = gpt_forward(params, idx, args)
    last_state = logits[:, -1, :]                            # (B, last_linear)
    mean, logvar = jnp.split(last_state, 2, axis=-1)         # chunk(2, -1)
    if args["fix_var"] > 0:
        logvar = jnp.full_like(mean, math.log(args["fix_var"]))
    return mean, logvar, att


# ----------------------------------------------------------------------------
# Deterministic parameter init (GPT-style: N(0, 0.02), zero biases, LN=ones/zeros)
# ----------------------------------------------------------------------------

def init_params(key, args):
    C = args["n_embd"]
    V = args["vocab_size"]
    Tmax = args["block_size"]
    out_dim = args["last_linear"]

    def nrm(k, shape):
        return 0.02 * jax.random.normal(k, shape, dtype=jnp.float32)

    keys = iter(jax.random.split(key, 4 + 6 * args["n_layer"]))
    params = {
        "tok_emb": nrm(next(keys), (V, C)),
        "pos_emb": nrm(next(keys), (1, Tmax, C)),
        "lnf_g": jnp.ones((C,), jnp.float32),
        "lnf_b": jnp.zeros((C,), jnp.float32),
        "head_w": nrm(next(keys), (C, out_dim)),
        "head_b": jnp.zeros((out_dim,), jnp.float32),
        "blocks": [],
    }
    _ = next(keys)
    for _layer in range(args["n_layer"]):
        params["blocks"].append({
            "ln1_g": jnp.ones((C,), jnp.float32), "ln1_b": jnp.zeros((C,), jnp.float32),
            "attn_w": nrm(next(keys), (C, 3 * C)), "attn_b": jnp.zeros((3 * C,), jnp.float32),
            "proj_w": nrm(next(keys), (C, C)), "proj_b": jnp.zeros((C,), jnp.float32),
            "ln2_g": jnp.ones((C,), jnp.float32), "ln2_b": jnp.zeros((C,), jnp.float32),
            "fc_w": nrm(next(keys), (C, 4 * C)), "fc_b": jnp.zeros((4 * C,), jnp.float32),
            "proj2_w": nrm(next(keys), (4 * C, C)), "proj2_b": jnp.zeros((C,), jnp.float32),
        })
        _ = next(keys)
    return params


# ----------------------------------------------------------------------------
# Main
# ----------------------------------------------------------------------------

if __name__ == "__main__":
    args = {
        "vocab_size": 16,
        "block_size": 8,
        "n_layer": 2,
        "n_head": 4,
        "n_embd": 32,
        "last_linear": 16,   # -> nz = 8 (mean/logvar each (B, 8))
        "fix_var": 0,
    }

    key = jax.random.PRNGKey(0)
    pkey, dkey = jax.random.split(key)
    params = init_params(pkey, args)

    B, T = 2, args["block_size"]
    idx = jax.random.randint(dkey, (B, T), 0, args["vocab_size"], dtype=jnp.int32)

    mean, logvar, att = jax.jit(
        functools.partial(gpt_encoder_forward, args=args)
    )(params, idx)
    jax.block_until_ready((mean, logvar, att))

    assert mean.shape == (B, args["last_linear"] // 2)
    assert logvar.shape == (B, args["last_linear"] // 2)
    assert att.shape == (B, args["n_head"], T, T)
    assert bool(jnp.all(jnp.isfinite(mean))) and bool(jnp.all(jnp.isfinite(logvar)))
    # attention rows are probability distributions (approx reciprocal -> slightly looser tol)
    assert bool(jnp.allclose(jnp.sum(att, axis=-1), 1.0, atol=5e-3))

    print("KERNEL_OK")
</pallas_src>

<mosaic_0001>
module attributes {stable_mosaic.version = 11 : i64} {
  func.func @_layernorm_kernel(%arg0: i32, %arg1: memref<16x32xf32, #tpu.memory_space<vmem>>, %arg2: memref<1x32xf32, #tpu.memory_space<vmem>>, %arg3: memref<1x32xf32, #tpu.memory_space<vmem>>, %arg4: memref<16x32xf32, #tpu.memory_space<vmem>>) attributes {dimension_semantics = [#tpu.dimension_semantics<parallel>], iteration_bounds = array<i64: 1>, scalar_prefetch = 0 : i64, scratch_operands = 0 : i64, tpu.core_type = #tpu.core_type<tc>, window_params = [{transform_indices = @transform_0, window_bounds = array<i64: 16, 32>}, {pipeline_mode = #tpu.pipeline_mode<synchronous>, transform_indices = @transform_1, window_bounds = array<i64: 1, 32>}, {pipeline_mode = #tpu.pipeline_mode<synchronous>, transform_indices = @transform_2, window_bounds = array<i64: 1, 32>}, {transform_indices = @transform_3, window_bounds = array<i64: 16, 32>}]} {
    %c0 = arith.constant 0 : index
    %c0_0 = arith.constant 0 : index
    %0 = vector.load %arg1[%c0, %c0_0] : memref<16x32xf32, #tpu.memory_space<vmem>>, vector<16x32xf32>
    %cst = arith.constant dense<0.000000e+00> : vector<16xf32>
    %1 = vector.multi_reduction <add>, %0, %cst [1] : vector<16x32xf32> to vector<16xf32>
    %2 = vector.shape_cast %1 : vector<16xf32> to vector<16x1xf32>
    %cst_1 = arith.constant 3.200000e+01 : f32
    %3 = vector.broadcast %cst_1 : f32 to vector<16x1xf32>
    %4 = arith.divf %2, %3 : vector<16x1xf32>
    %5 = vector.broadcast %4 : vector<16x1xf32> to vector<16x32xf32>
    %6 = arith.subf %0, %5 : vector<16x32xf32>
    %7 = arith.mulf %6, %6 : vector<16x32xf32>
    %cst_2 = arith.constant dense<0.000000e+00> : vector<16xf32>
    %8 = vector.multi_reduction <add>, %7, %cst_2 [1] : vector<16x32xf32> to vector<16xf32>
    %9 = vector.shape_cast %8 : vector<16xf32> to vector<16x1xf32>
    %cst_3 = arith.constant 3.200000e+01 : f32
    %10 = vector.broadcast %cst_3 : f32 to vector<16x1xf32>
    %11 = arith.divf %9, %10 : vector<16x1xf32>
    %12 = vector.broadcast %4 : vector<16x1xf32> to vector<16x32xf32>
    %13 = arith.subf %0, %12 : vector<16x32xf32>
    %cst_4 = arith.constant 9.99999974E-6 : f32
    %14 = vector.broadcast %cst_4 : f32 to vector<16x1xf32>
    %15 = arith.addf %11, %14 : vector<16x1xf32>
    %16 = math.rsqrt %15 : vector<16x1xf32>
    %17 = vector.broadcast %16 : vector<16x1xf32> to vector<16x32xf32>
    %18 = arith.mulf %13, %17 : vector<16x32xf32>
    %c0_5 = arith.constant 0 : index
    %c0_6 = arith.constant 0 : index
    %19 = vector.load %arg2[%c0_5, %c0_6] : memref<1x32xf32, #tpu.memory_space<vmem>>, vector<1x32xf32>
    %20 = vector.broadcast %19 : vector<1x32xf32> to vector<16x32xf32>
    %21 = arith.mulf %18, %20 : vector<16x32xf32>
    %c0_7 = arith.constant 0 : index
    %c0_8 = arith.constant 0 : index
    %22 = vector.load %arg3[%c0_7, %c0_8] : memref<1x32xf32, #tpu.memory_space<vmem>>, vector<1x32xf32>
    %23 = vector.broadcast %22 : vector<1x32xf32> to vector<16x32xf32>
    %24 = arith.addf %21, %23 : vector<16x32xf32>
    %c0_9 = arith.constant 0 : index
    %c0_10 = arith.constant 0 : index
    %25 = vector.load %arg4[%c0_9, %c0_10] : memref<16x32xf32, #tpu.memory_space<vmem>>, vector<16x32xf32>
    tpu.vector_store %arg4[%c0_9, %c0_10], %24 {strides = array<i32>} : memref<16x32xf32, #tpu.memory_space<vmem>>, vector<16x32xf32>,
    return
  }
  func.func @transform_0(%arg0: i32) -> (i32, i32) {
    %c0_i32 = arith.constant 0 : i32
    %c0_i32_0 = arith.constant 0 : i32
    return %arg0, %c0_i32 : i32, i32
  }
  func.func @transform_1(%arg0: i32) -> (i32, i32) {
    %c0_i32 = arith.constant 0 : i32
    %c0_i32_0 = arith.constant 0 : i32
    %c0_i32_1 = arith.constant 0 : i32
    return %c0_i32, %c0_i32_0 : i32, i32
  }
  func.func @transform_2(%arg0: i32) -> (i32, i32) {
    %c0_i32 = arith.constant 0 : i32
    %c0_i32_0 = arith.constant 0 : i32
    %c0_i32_1 = arith.constant 0 : i32
    return %c0_i32, %c0_i32_0 : i32, i32
  }
  func.func @transform_3(%arg0: i32) -> (i32, i32) {
    %c0_i32 = arith.constant 0 : i32
    %c0_i32_0 = arith.constant 0 : i32
    return %arg0, %c0_i32 : i32, i32
  }
}

module attributes {stable_mosaic.version = 11 : i64} {
  func.func @kernel(%arg0: i32, %arg1: i32, %arg2: i32, %arg3: memref<16x32xf32, #tpu.memory_space<vmem>>, %arg4: memref<32x128xf32, #tpu.memory_space<vmem>>, %arg5: memref<1x128xf32, #tpu.memory_space<vmem>>, %arg6: memref<16x128xf32, #tpu.memory_space<vmem>>, %arg7: memref<16x128xf32, #tpu.memory_space<vmem>>) attributes {dimension_semantics = [#tpu.dimension_semantics<parallel>, #tpu.dimension_semantics<parallel>, #tpu.dimension_semantics<arbitrary>], iteration_bounds = array<i64: 1, 1, 1>, scalar_prefetch = 0 : i64, scratch_operands = 1 : i64, tpu.core_type = #tpu.core_type<tc>, window_params = [{transform_indices = @transform_0, window_bounds = array<i64: 16, 32>}, {transform_indices = @transform_1, window_bounds = array<i64: 32, 128>}, {transform_indices = @transform_2, window_bounds = array<i64: 1, 128>}, {transform_indices = @transform_3, window_bounds = array<i64: 16, 128>}]} {
    %c0_i32 = arith.constant 0 : i32
    %0 = arith.cmpi eq, %arg2, %c0_i32 : i32
    %1 = arith.extui %0 : i1 to i32
    %c0_i32_0 = arith.constant 0 : i32
    %2 = arith.cmpi ne, %1, %c0_i32_0 : i32
    scf.if %2 {
      %cst_10 = arith.constant 0.000000e+00 : f32
      %12 = vector.broadcast %cst_10 : f32 to vector<16x128xf32>
      %c0_11 = arith.constant 0 : index
      %c0_12 = arith.constant 0 : index
      %13 = vector.load %arg7[%c0_11, %c0_12] : memref<16x128xf32, #tpu.memory_space<vmem>>, vector<16x128xf32>
      tpu.vector_store %arg7[%c0_11, %c0_12], %12 {strides = array<i32>} : memref<16x128xf32, #tpu.memory_space<vmem>>, vector<16x128xf32>,
    } else {
    }
    %c0 = arith.constant 0 : index
    %c0_1 = arith.constant 0 : index
    %3 = vector.load %arg7[%c0, %c0_1] : memref<16x128xf32, #tpu.memory_space<vmem>>, vector<16x128xf32>
    %c0_2 = arith.constant 0 : index
    %c0_3 = arith.constant 0 : index
    %4 = vector.load %arg3[%c0_2, %c0_3] : memref<16x32xf32, #tpu.memory_space<vmem>>, vector<16x32xf32>
    %c0_4 = arith.constant 0 : index
    %c0_5 = arith.constant 0 : index
    %5 = vector.load %arg4[%c0_4, %c0_5] : memref<32x128xf32, #tpu.memory_space<vmem>>, vector<32x128xf32>
    %cst = arith.constant dense<0.000000e+00> : vector<16x128xf32>
    %6 = tpu.matmul %4, %5, %cst {dimension_numbers = #tpu.dot_dimension_numbers<[1], [0], [0], [1], [0, 0, 1, 1], [], []>} : vector<16x32xf32>, vector<32x128xf32>, vector<16x128xf32> -> vector<16x128xf32>
    %7 = arith.addf %3, %6 : vector<16x128xf32>
    %c0_6 = arith.constant 0 : index
    %c0_7 = arith.constant 0 : index
    %8 = vector.load %arg7[%c0_6, %c0_7] : memref<16x128xf32, #tpu.memory_space<vmem>>, vector<16x128xf32>
    tpu.vector_store %arg7[%c0_6, %c0_7], %7 {strides = array<i32>} : memref<16x128xf32, #tpu.memory_space<vmem>>, vector<16x128xf32>,
    %c0_i32_8 = arith.constant 0 : i32
    %9 = arith.cmpi eq, %arg2, %c0_i32_8 : i32
    %10 = arith.extui %9 : i1 to i32
    %c0_i32_9 = arith.constant 0 : i32
    %11 = arith.cmpi ne, %10, %c0_i32_9 : i32
    scf.if %11 {
      %c0_10 = arith.constant 0 : index
      %c0_11 = arith.constant 0 : index
      %12 = vector.load %arg7[%c0_10, %c0_11] : memref<16x128xf32, #tpu.memory_space<vmem>>, vector<16x128xf32>
      %c0_12 = arith.constant 0 : index
      %c0_13 = arith.constant 0 : index
      %13 = vector.load %arg5[%c0_12, %c0_13] : memref<1x128xf32, #tpu.memory_space<vmem>>, vector<1x128xf32>
      %14 = vector.broadcast %13 : vector<1x128xf32> to vector<16x128xf32>
      %15 = arith.addf %12, %14 : vector<16x128xf32>
      %c0_14 = arith.constant 0 : index
      %c0_15 = arith.constant 0 : index
      %16 = vector.load %arg6[%c0_14, %c0_15] : memref<16x128xf32, #tpu.memory_space<vmem>>, vector<16x128xf32>
      tpu.vector_store %arg6[%c0_14, %c0_15], %15 {strides = array<i32>} : memref<16x128xf32, #tpu.memory_space<vmem>>, vector<16x128xf32>,
    } else {
    }
    return
  }
  func.func @transform_0(%arg0: i32, %arg1: i32, %arg2: i32) -> (i32, i32) {
    %c0_i32 = arith.constant 0 : i32
    return %arg0, %arg2 : i32, i32
  }
  func.func @transform_1(%arg0: i32, %arg1: i32, %arg2: i32) -> (i32, i32) {
    %c0_i32 = arith.constant 0 : i32
    return %arg2, %arg1 : i32, i32
  }
  func.func @transform_2(%arg0: i32, %arg1: i32, %arg2: i32) -> (i32, i32) {
    %c0_i32 = arith.constant 0 : i32
    %c0_i32_0 = arith.constant 0 : i32
    return %c0_i32, %arg1 : i32, i32
  }
  func.func @transform_3(%arg0: i32, %arg1: i32, %arg2: i32) -> (i32, i32) {
    %c0_i32 = arith.constant 0 : i32
    return %arg0, %arg1 : i32, i32
  }
}

module attributes {stable_mosaic.version = 11 : i64} {
  func.func @_attn_kernel(%arg0: i32, %arg1: memref<4x8x8xf32, #tpu.memory_space<vmem>>, %arg2: memref<4x8x8xf32, #tpu.memory_space<vmem>>, %arg3: memref<4x8x8xf32, #tpu.memory_space<vmem>>, %arg4: memref<4x8x8xf32, #tpu.memory_space<vmem>>) attributes {dimension_semantics = [#tpu.dimension_semantics<parallel>], iteration_bounds = array<i64: 2>, scalar_prefetch = 0 : i64, scratch_operands = 0 : i64, tpu.core_type = #tpu.core_type<tc>, window_params = [{transform_indices = @transform_0, window_bounds = array<i64: 4, 8, 8>}, {transform_indices = @transform_1, window_bounds = array<i64: 4, 8, 8>}, {transform_indices = @transform_2, window_bounds = array<i64: 4, 8, 8>}, {transform_indices = @transform_3, window_bounds = array<i64: 4, 8, 8>}]} {
    %c0 = arith.constant 0 : index
    %c0_0 = arith.constant 0 : index
    %c0_1 = arith.constant 0 : index
    %0 = vector.load %arg1[%c0, %c0_0, %c0_1] : memref<4x8x8xf32, #tpu.memory_space<vmem>>, vector<4x8x8xf32>
    %c0_2 = arith.constant 0 : index
    %c0_3 = arith.constant 0 : index
    %c0_4 = arith.constant 0 : index
    %1 = vector.load %arg2[%c0_2, %c0_3, %c0_4] : memref<4x8x8xf32, #tpu.memory_space<vmem>>, vector<4x8x8xf32>
    %c0_5 = arith.constant 0 : index
    %c0_6 = arith.constant 0 : index
    %c0_7 = arith.constant 0 : index
    %2 = vector.load %arg3[%c0_5, %c0_6, %c0_7] : memref<4x8x8xf32, #tpu.memory_space<vmem>>, vector<4x8x8xf32>
    "tpu.trace_start"() <{level = 10 : i32, message = "hqd,hkd->hqk"}> : () -> ()
    %cst = arith.constant dense<0.000000e+00> : vector<4x8x8xf32>
    %3 = tpu.matmul %0, %1, %cst {dimension_numbers = #tpu.dot_dimension_numbers<[2], [2], [1], [1], [0, 0, 0, 1, 1, 1], [0], [0]>} : vector<4x8x8xf32>, vector<4x8x8xf32>, vector<4x8x8xf32> -> vector<4x8x8xf32>
    "tpu.trace_stop"() : () -> ()
    %cst_8 = arith.constant 0.353553385 : f32
    %4 = vector.broadcast %cst_8 : f32 to vector<4x8x8xf32>
    %5 = arith.mulf %3, %4 : vector<4x8x8xf32>
    %6 = tpu.iota {dimensions = array<i32: 1>} : vector<4x8x8xi32>
    %7 = tpu.iota {dimensions = array<i32: 2>} : vector<4x8x8xi32>
    %8 = arith.cmpi sle, %7, %6 : vector<4x8x8xi32>
    %cst_9 = arith.constant -1.000000e+30 : f32
    %9 = vector.broadcast %cst_9 : f32 to vector<4x8x8xf32>
    %10 = arith.select %8, %5, %9 : vector<4x8x8xi1>, vector<4x8x8xf32>
    %cst_10 = arith.constant dense<0xFF800000> : vector<4x8xf32>
    %11 = vector.multi_reduction <maximumf>, %10, %cst_10 [2] : vector<4x8x8xf32> to vector<4x8xf32>
    %12 = vector.shape_cast %11 : vector<4x8xf32> to vector<4x8x1xf32>
    %13 = vector.broadcast %12 : vector<4x8x1xf32> to vector<4x8x8xf32>
    %14 = arith.subf %10, %13 : vector<4x8x8xf32>
    %15 = math.exp %14 : vector<4x8x8xf32>
    %cst_11 = arith.constant dense<0.000000e+00> : vector<4x8xf32>
    %16 = vector.multi_reduction <add>, %15, %cst_11 [2] : vector<4x8x8xf32> to vector<4x8xf32>
    %17 = vector.shape_cast %16 : vector<4x8xf32> to vector<4x8x1xf32>
    %18 = tpu.reciprocal %17 {approx = true} : vector<4x8x1xf32> -> vector<4x8x1xf32>
    %19 = vector.broadcast %18 : vector<4x8x1xf32> to vector<4x8x8xf32>
    %20 = arith.mulf %15, %19 : vector<4x8x8xf32>
    "tpu.trace_start"() <{level = 10 : i32, message = "hqk,hkd->hqd"}> : () -> ()
    %cst_12 = arith.constant dense<0.000000e+00> : vector<4x8x8xf32>
    %21 = tpu.matmul %20, %2, %cst_12 {dimension_numbers = #tpu.dot_dimension_numbers<[2], [1], [1], [2], [0, 0, 0, 1, 1, 2], [0], [0]>} : vector<4x8x8xf32>, vector<4x8x8xf32>, vector<4x8x8xf32> -> vector<4x8x8xf32>
    "tpu.trace_stop"() : () -> ()
    %c0_13 = arith.constant 0 : index
    %c0_14 = arith.constant 0 : index
    %c0_15 = arith.constant 0 : index
    %22 = vector.load %arg4[%c0_13, %c0_14, %c0_15] : memref<4x8x8xf32, #tpu.memory_space<vmem>>, vector<4x8x8xf32>
    tpu.vector_store %arg4[%c0_13, %c0_14, %c0_15], %21 {strides = array<i32>} : memref<4x8x8xf32, #tpu.memory_space<vmem>>, vector<4x8x8xf32>,
    return
  }
  func.func @transform_0(%arg0: i32) -> (i32, i32, i32) {
    %c0_i32 = arith.constant 0 : i32
    %c0_i32_0 = arith.constant 0 : i32
    %c0_i32_1 = arith.constant 0 : i32
    return %arg0, %c0_i32, %c0_i32_0 : i32, i32, i32
  }
  func.func @transform_1(%arg0: i32) -> (i32, i32, i32) {
    %c0_i32 = arith.constant 0 : i32
    %c0_i32_0 = arith.constant 0 : i32
    %c0_i32_1 = arith.constant 0 : i32
    return %arg0, %c0_i32, %c0_i32_0 : i32, i32, i32
  }
  func.func @transform_2(%arg0: i32) -> (i32, i32, i32) {
    %c0_i32 = arith.constant 0 : i32
    %c0_i32_0 = arith.constant 0 : i32
    %c0_i32_1 = arith.constant 0 : i32
    return %arg0, %c0_i32, %c0_i32_0 : i32, i32, i32
  }
  func.func @transform_3(%arg0: i32) -> (i32, i32, i32) {
    %c0_i32 = arith.constant 0 : i32
    %c0_i32_0 = arith.constant 0 : i32
    %c0_i32_1 = arith.constant 0 : i32
    return %arg0, %c0_i32, %c0_i32_0 : i32, i32, i32
  }
}

module attributes {stable_mosaic.version = 11 : i64} {
  func.func @kernel(%arg0: i32, %arg1: i32, %arg2: i32, %arg3: memref<16x32xf32, #tpu.memory_space<vmem>>, %arg4: memref<32x128xf32, #tpu.memory_space<vmem>>, %arg5: memref<1x128xf32, #tpu.memory_space<vmem>>, %arg6: memref<16x128xf32, #tpu.memory_space<vmem>>, %arg7: memref<16x128xf32, #tpu.memory_space<vmem>>, %arg8: memref<16x128xf32, #tpu.memory_space<vmem>>) attributes {dimension_semantics = [#tpu.dimension_semantics<parallel>, #tpu.dimension_semantics<parallel>, #tpu.dimension_semantics<arbitrary>], iteration_bounds = array<i64: 1, 1, 1>, scalar_prefetch = 0 : i64, scratch_operands = 1 : i64, tpu.core_type = #tpu.core_type<tc>, window_params = [{transform_indices = @transform_0, window_bounds = array<i64: 16, 32>}, {transform_indices = @transform_1, window_bounds = array<i64: 32, 128>}, {transform_indices = @transform_2, window_bounds = array<i64: 1, 128>}, {transform_indices = @transform_3, window_bounds = array<i64: 16, 128>}, {transform_indices = @transform_4, window_bounds = array<i64: 16, 128>}]} {
    %c0_i32 = arith.constant 0 : i32
    %0 = arith.cmpi eq, %arg2, %c0_i32 : i32
    %1 = arith.extui %0 : i1 to i32
    %c0_i32_0 = arith.constant 0 : i32
    %2 = arith.cmpi ne, %1, %c0_i32_0 : i32
    scf.if %2 {
      %cst_10 = arith.constant 0.000000e+00 : f32
      %12 = vector.broadcast %cst_10 : f32 to vector<16x128xf32>
      %c0_11 = arith.constant 0 : index
      %c0_12 = arith.constant 0 : index
      %13 = vector.load %arg8[%c0_11, %c0_12] : memref<16x128xf32, #tpu.memory_space<vmem>>, vector<16x128xf32>
      tpu.vector_store %arg8[%c0_11, %c0_12], %12 {strides = array<i32>} : memref<16x128xf32, #tpu.memory_space<vmem>>, vector<16x128xf32>,
    } else {
    }
    %c0 = arith.constant 0 : index
    %c0_1 = arith.constant 0 : index
    %3 = vector.load %arg8[%c0, %c0_1] : memref<16x128xf32, #tpu.memory_space<vmem>>, vector<16x128xf32>
    %c0_2 = arith.constant 0 : index
    %c0_3 = arith.constant 0 : index
    %4 = vector.load %arg3[%c0_2, %c0_3] : memref<16x32xf32, #tpu.memory_space<vmem>>, vector<16x32xf32>
    %c0_4 = arith.constant 0 : index
    %c0_5 = arith.constant 0 : index
    %5 = vector.load %arg4[%c0_4, %c0_5] : memref<32x128xf32, #tpu.memory_space<vmem>>, vector<32x128xf32>
    %cst = arith.constant dense<0.000000e+00> : vector<16x128xf32>
    %6 = tpu.matmul %4, %5, %cst {dimension_numbers = #tpu.dot_dimension_numbers<[1], [0], [0], [1], [0, 0, 1, 1], [], []>} : vector<16x32xf32>, vector<32x128xf32>, vector<16x128xf32> -> vector<16x128xf32>
    %7 = arith.addf %3, %6 : vector<16x128xf32>
    %c0_6 = arith.constant 0 : index
    %c0_7 = arith.constant 0 : index
    %8 = vector.load %arg8[%c0_6, %c0_7] : memref<16x128xf32, #tpu.memory_space<vmem>>, vector<16x128xf32>
    tpu.vector_store %arg8[%c0_6, %c0_7], %7 {strides = array<i32>} : memref<16x128xf32, #tpu.memory_space<vmem>>, vector<16x128xf32>,
    %c0_i32_8 = arith.constant 0 : i32
    %9 = arith.cmpi eq, %arg2, %c0_i32_8 : i32
    %10 = arith.extui %9 : i1 to i32
    %c0_i32_9 = arith.constant 0 : i32
    %11 = arith.cmpi ne, %10, %c0_i32_9 : i32
    scf.if %11 {
      %c0_10 = arith.constant 0 : index
      %c0_11 = arith.constant 0 : index
      %12 = vector.load %arg8[%c0_10, %c0_11] : memref<16x128xf32, #tpu.memory_space<vmem>>, vector<16x128xf32>
      %c0_12 = arith.constant 0 : index
      %c0_13 = arith.constant 0 : index
      %13 = vector.load %arg5[%c0_12, %c0_13] : memref<1x128xf32, #tpu.memory_space<vmem>>, vector<1x128xf32>
      %14 = vector.broadcast %13 : vector<1x128xf32> to vector<16x128xf32>
      %15 = arith.addf %12, %14 : vector<16x128xf32>
      %c0_14 = arith.constant 0 : index
      %c0_15 = arith.constant 0 : index
      %16 = vector.load %arg6[%c0_14, %c0_15] : memref<16x128xf32, #tpu.memory_space<vmem>>, vector<16x128xf32>
      %17 = arith.addf %15, %16 : vector<16x128xf32>
      %c0_16 = arith.constant 0 : index
      %c0_17 = arith.constant 0 : index
      %18 = vector.load %arg7[%c0_16, %c0_17] : memref<16x128xf32, #tpu.memory_space<vmem>>, vector<16x128xf32>
      tpu.vector_store %arg7[%c0_16, %c0_17], %17 {strides = array<i32>} : memref<16x128xf32, #tpu.memory_space<vmem>>, vector<16x128xf32>,
    } else {
    }
    return
  }
  func.func @transform_0(%arg0: i32, %arg1: i32, %arg2: i32) -> (i32, i32) {
    %c0_i32 = arith.constant 0 : i32
    return %arg0, %arg2 : i32, i32
  }
  func.func @transform_1(%arg0: i32, %arg1: i32, %arg2: i32) -> (i32, i32) {
    %c0_i32 = arith.constant 0 : i32
    return %arg2, %arg1 : i32, i32
  }
  func.func @transform_2(%arg0: i32, %arg1: i32, %arg2: i32) -> (i32, i32) {
    %c0_i32 = arith.constant 0 : i32
    %c0_i32_0 = arith.constant 0 : i32
    return %c0_i32, %arg1 : i32, i32
  }
  func.func @transform_3(%arg0: i32, %arg1: i32, %arg2: i32) -> (i32, i32) {
    %c0_i32 = arith.constant 0 : i32
    return %arg0, %arg1 : i32, i32
  }
  func.func @transform_4(%arg0: i32, %arg1: i32, %arg2: i32) -> (i32, i32) {
    %c0_i32 = arith.constant 0 : i32
    return %arg0, %arg1 : i32, i32
  }
}

module attributes {stable_mosaic.version = 11 : i64} {
  func.func @kernel(%arg0: i32, %arg1: i32, %arg2: i32, %arg3: memref<16x32xf32, #tpu.memory_space<vmem>>, %arg4: memref<32x128xf32, #tpu.memory_space<vmem>>, %arg5: memref<1x128xf32, #tpu.memory_space<vmem>>, %arg6: memref<16x128xf32, #tpu.memory_space<vmem>>, %arg7: memref<16x128xf32, #tpu.memory_space<vmem>>) attributes {dimension_semantics = [#tpu.dimension_semantics<parallel>, #tpu.dimension_semantics<parallel>, #tpu.dimension_semantics<arbitrary>], iteration_bounds = array<i64: 1, 1, 1>, scalar_prefetch = 0 : i64, scratch_operands = 1 : i64, tpu.core_type = #tpu.core_type<tc>, window_params = [{transform_indices = @transform_0, window_bounds = array<i64: 16, 32>}, {transform_indices = @transform_1, window_bounds = array<i64: 32, 128>}, {transform_indices = @transform_2, window_bounds = array<i64: 1, 128>}, {transform_indices = @transform_3, window_bounds = array<i64: 16, 128>}]} {
    %c0_i32 = arith.constant 0 : i32
    %0 = arith.cmpi eq, %arg2, %c0_i32 : i32
    %1 = arith.extui %0 : i1 to i32
    %c0_i32_0 = arith.constant 0 : i32
    %2 = arith.cmpi ne, %1, %c0_i32_0 : i32
    scf.if %2 {
      %cst_10 = arith.constant 0.000000e+00 : f32
      %12 = vector.broadcast %cst_10 : f32 to vector<16x128xf32>
      %c0_11 = arith.constant 0 : index
      %c0_12 = arith.constant 0 : index
      %13 = vector.load %arg7[%c0_11, %c0_12] : memref<16x128xf32, #tpu.memory_space<vmem>>, vector<16x128xf32>
      tpu.vector_store %arg7[%c0_11, %c0_12], %12 {strides = array<i32>} : memref<16x128xf32, #tpu.memory_space<vmem>>, vector<16x128xf32>,
    } else {
    }
    %c0 = arith.constant 0 : index
    %c0_1 = arith.constant 0 : index
    %3 = vector.load %arg7[%c0, %c0_1] : memref<16x128xf32, #tpu.memory_space<vmem>>, vector<16x128xf32>
    %c0_2 = arith.constant 0 : index
    %c0_3 = arith.constant 0 : index
    %4 = vector.load %arg3[%c0_2, %c0_3] : memref<16x32xf32, #tpu.memory_space<vmem>>, vector<16x32xf32>
    %c0_4 = arith.constant 0 : index
    %c0_5 = arith.constant 0 : index
    %5 = vector.load %arg4[%c0_4, %c0_5] : memref<32x128xf32, #tpu.memory_space<vmem>>, vector<32x128xf32>
    %cst = arith.constant dense<0.000000e+00> : vector<16x128xf32>
    %6 = tpu.matmul %4, %5, %cst {dimension_numbers = #tpu.dot_dimension_numbers<[1], [0], [0], [1], [0, 0, 1, 1], [], []>} : vector<16x32xf32>, vector<32x128xf32>, vector<16x128xf32> -> vector<16x128xf32>
    %7 = arith.addf %3, %6 : vector<16x128xf32>
    %c0_6 = arith.constant 0 : index
    %c0_7 = arith.constant 0 : index
    %8 = vector.load %arg7[%c0_6, %c0_7] : memref<16x128xf32, #tpu.memory_space<vmem>>, vector<16x128xf32>
    tpu.vector_store %arg7[%c0_6, %c0_7], %7 {strides = array<i32>} : memref<16x128xf32, #tpu.memory_space<vmem>>, vector<16x128xf32>,
    %c0_i32_8 = arith.constant 0 : i32
    %9 = arith.cmpi eq, %arg2, %c0_i32_8 : i32
    %10 = arith.extui %9 : i1 to i32
    %c0_i32_9 = arith.constant 0 : i32
    %11 = arith.cmpi ne, %10, %c0_i32_9 : i32
    scf.if %11 {
      %c0_10 = arith.constant 0 : index
      %c0_11 = arith.constant 0 : index
      %12 = vector.load %arg7[%c0_10, %c0_11] : memref<16x128xf32, #tpu.memory_space<vmem>>, vector<16x128xf32>
      %c0_12 = arith.constant 0 : index
      %c0_13 = arith.constant 0 : index
      %13 = vector.load %arg5[%c0_12, %c0_13] : memref<1x128xf32, #tpu.memory_space<vmem>>, vector<1x128xf32>
      %14 = vector.broadcast %13 : vector<1x128xf32> to vector<16x128xf32>
      %15 = arith.addf %12, %14 : vector<16x128xf32>
      %cst_14 = arith.constant 5.000000e-01 : f32
      %16 = vector.broadcast %cst_14 : f32 to vector<16x128xf32>
      %17 = arith.mulf %16, %15 : vector<16x128xf32>
      %cst_15 = arith.constant 4.471500e-02 : f32
      %18 = vector.broadcast %cst_15 : f32 to vector<16x128xf32>
      %19 = arith.mulf %18, %15 : vector<16x128xf32>
      %20 = arith.mulf %19, %15 : vector<16x128xf32>
      %21 = arith.mulf %20, %15 : vector<16x128xf32>
      %22 = arith.addf %15, %21 : vector<16x128xf32>
      %cst_16 = arith.constant 0.797884583 : f32
      %23 = vector.broadcast %cst_16 : f32 to vector<16x128xf32>
      %24 = arith.mulf %23, %22 : vector<16x128xf32>
      %25 = math.tanh %24 : vector<16x128xf32>
      %cst_17 = arith.constant 1.000000e+00 : f32
      %26 = vector.broadcast %cst_17 : f32 to vector<16x128xf32>
      %27 = arith.addf %26, %25 : vector<16x128xf32>
      %28 = arith.mulf %17, %27 : vector<16x128xf32>
      %c0_18 = arith.constant 0 : index
      %c0_19 = arith.constant 0 : index
      %29 = vector.load %arg6[%c0_18, %c0_19] : memref<16x128xf32, #tpu.memory_space<vmem>>, vector<16x128xf32>
      tpu.vector_store %arg6[%c0_18, %c0_19], %28 {strides = array<i32>} : memref<16x128xf32, #tpu.memory_space<vmem>>, vector<16x128xf32>,
    } else {
    }
    return
  }
  func.func @transform_0(%arg0: i32, %arg1: i32, %arg2: i32) -> (i32, i32) {
    %c0_i32 = arith.constant 0 : i32
    return %arg0, %arg2 : i32, i32
  }
  func.func @transform_1(%arg0: i32, %arg1: i32, %arg2: i32) -> (i32, i32) {
    %c0_i32 = arith.constant 0 : i32
    return %arg2, %arg1 : i32, i32
  }
  func.func @transform_2(%arg0: i32, %arg1: i32, %arg2: i32) -> (i32, i32) {
    %c0_i32 = arith.constant 0 : i32
    %c0_i32_0 = arith.constant 0 : i32
    return %c0_i32, %arg1 : i32, i32
  }
  func.func @transform_3(%arg0: i32, %arg1: i32, %arg2: i32) -> (i32, i32) {
    %c0_i32 = arith.constant 0 : i32
    return %arg0, %arg1 : i32, i32
  }
}

module attributes {stable_mosaic.version = 11 : i64} {
  func.func @kernel(%arg0: i32, %arg1: i32, %arg2: i32, %arg3: memref<16x128xf32, #tpu.memory_space<vmem>>, %arg4: memref<128x128xf32, #tpu.memory_space<vmem>>, %arg5: memref<1x128xf32, #tpu.memory_space<vmem>>, %arg6: memref<16x128xf32, #tpu.memory_space<vmem>>, %arg7: memref<16x128xf32, #tpu.memory_space<vmem>>, %arg8: memref<16x128xf32, #tpu.memory_space<vmem>>) attributes {dimension_semantics = [#tpu.dimension_semantics<parallel>, #tpu.dimension_semantics<parallel>, #tpu.dimension_semantics<arbitrary>], iteration_bounds = array<i64: 1, 1, 1>, scalar_prefetch = 0 : i64, scratch_operands = 1 : i64, tpu.core_type = #tpu.core_type<tc>, window_params = [{transform_indices = @transform_0, window_bounds = array<i64: 16, 128>}, {transform_indices = @transform_1, window_bounds = array<i64: 128, 128>}, {transform_indices = @transform_2, window_bounds = array<i64: 1, 128>}, {transform_indices = @transform_3, window_bounds = array<i64: 16, 128>}, {transform_indices = @transform_4, window_bounds = array<i64: 16, 128>}]} {
    %c0_i32 = arith.constant 0 : i32
    %0 = arith.cmpi eq, %arg2, %c0_i32 : i32
    %1 = arith.extui %0 : i1 to i32
    %c0_i32_0 = arith.constant 0 : i32
    %2 = arith.cmpi ne, %1, %c0_i32_0 : i32
    scf.if %2 {
      %cst_10 = arith.constant 0.000000e+00 : f32
      %12 = vector.broadcast %cst_10 : f32 to vector<16x128xf32>
      %c0_11 = arith.constant 0 : index
      %c0_12 = arith.constant 0 : index
      %13 = vector.load %arg8[%c0_11, %c0_12] : memref<16x128xf32, #tpu.memory_space<vmem>>, vector<16x128xf32>
      tpu.vector_store %arg8[%c0_11, %c0_12], %12 {strides = array<i32>} : memref<16x128xf32, #tpu.memory_space<vmem>>, vector<16x128xf32>,
    } else {
    }
    %c0 = arith.constant 0 : index
    %c0_1 = arith.constant 0 : index
    %3 = vector.load %arg8[%c0, %c0_1] : memref<16x128xf32, #tpu.memory_space<vmem>>, vector<16x128xf32>
    %c0_2 = arith.constant 0 : index
    %c0_3 = arith.constant 0 : index
    %4 = vector.load %arg3[%c0_2, %c0_3] : memref<16x128xf32, #tpu.memory_space<vmem>>, vector<16x128xf32>
    %c0_4 = arith.constant 0 : index
    %c0_5 = arith.constant 0 : index
    %5 = vector.load %arg4[%c0_4, %c0_5] : memref<128x128xf32, #tpu.memory_space<vmem>>, vector<128x128xf32>
    %cst = arith.constant dense<0.000000e+00> : vector<16x128xf32>
    %6 = tpu.matmul %4, %5, %cst {dimension_numbers = #tpu.dot_dimension_numbers<[1], [0], [0], [1], [0, 0, 1, 1], [], []>} : vector<16x128xf32>, vector<128x128xf32>, vector<16x128xf32> -> vector<16x128xf32>
    %7 = arith.addf %3, %6 : vector<16x128xf32>
    %c0_6 = arith.constant 0 : index
    %c0_7 = arith.constant 0 : index
    %8 = vector.load %arg8[%c0_6, %c0_7] : memref<16x128xf32, #tpu.memory_space<vmem>>, vector<16x128xf32>
    tpu.vector_store %arg8[%c0_6, %c0_7], %7 {strides = array<i32>} : memref<16x128xf32, #tpu.memory_space<vmem>>, vector<16x128xf32>,
    %c0_i32_8 = arith.constant 0 : i32
    %9 = arith.cmpi eq, %arg2, %c0_i32_8 : i32
    %10 = arith.extui %9 : i1 to i32
    %c0_i32_9 = arith.constant 0 : i32
    %11 = arith.cmpi ne, %10, %c0_i32_9 : i32
    scf.if %11 {
      %c0_10 = arith.constant 0 : index
      %c0_11 = arith.constant 0 : index
      %12 = vector.load %arg8[%c0_10, %c0_11] : memref<16x128xf32, #tpu.memory_space<vmem>>, vector<16x128xf32>
      %c0_12 = arith.constant 0 : index
      %c0_13 = arith.constant 0 : index
      %13 = vector.load %arg5[%c0_12, %c0_13] : memref<1x128xf32, #tpu.memory_space<vmem>>, vector<1x128xf32>
      %14 = vector.broadcast %13 : vector<1x128xf32> to vector<16x128xf32>
      %15 = arith.addf %12, %14 : vector<16x128xf32>
      %c0_14 = arith.constant 0 : index
      %c0_15 = arith.constant 0 : index
      %16 = vector.load %arg6[%c0_14, %c0_15] : memref<16x128xf32, #tpu.memory_space<vmem>>, vector<16x128xf32>
      %17 = arith.addf %15, %16 : vector<16x128xf32>
      %c0_16 = arith.constant 0 : index
      %c0_17 = arith.constant 0 : index
      %18 = vector.load %arg7[%c0_16, %c0_17] : memref<16x128xf32, #tpu.memory_space<vmem>>, vector<16x128xf32>
      tpu.vector_store %arg7[%c0_16, %c0_17], %17 {strides = array<i32>} : memref<16x128xf32, #tpu.memory_space<vmem>>, vector<16x128xf32>,
    } else {
    }
    return
  }
  func.func @transform_0(%arg0: i32, %arg1: i32, %arg2: i32) -> (i32, i32) {
    %c0_i32 = arith.constant 0 : i32
    return %arg0, %arg2 : i32, i32
  }
  func.func @transform_1(%arg0: i32, %arg1: i32, %arg2: i32) -> (i32, i32) {
    %c0_i32 = arith.constant 0 : i32
    return %arg2, %arg1 : i32, i32
  }
  func.func @transform_2(%arg0: i32, %arg1: i32, %arg2: i32) -> (i32, i32) {
    %c0_i32 = arith.constant 0 : i32
    %c0_i32_0 = arith.constant 0 : i32
    return %c0_i32, %arg1 : i32, i32
  }
  func.func @transform_3(%arg0: i32, %arg1: i32, %arg2: i32) -> (i32, i32) {
    %c0_i32 = arith.constant 0 : i32
    return %arg0, %arg1 : i32, i32
  }
  func.func @transform_4(%arg0: i32, %arg1: i32, %arg2: i32) -> (i32, i32) {
    %c0_i32 = arith.constant 0 : i32
    return %arg0, %arg1 : i32, i32
  }
}

module attributes {stable_mosaic.version = 11 : i64} {
  func.func @_attn_att_kernel(%arg0: i32, %arg1: memref<4x8x8xf32, #tpu.memory_space<vmem>>, %arg2: memref<4x8x8xf32, #tpu.memory_space<vmem>>, %arg3: memref<4x8x8xf32, #tpu.memory_space<vmem>>, %arg4: memref<4x8x8xf32, #tpu.memory_space<vmem>>, %arg5: memref<4x8x8xf32, #tpu.memory_space<vmem>>) attributes {dimension_semantics = [#tpu.dimension_semantics<parallel>], iteration_bounds = array<i64: 2>, scalar_prefetch = 0 : i64, scratch_operands = 0 : i64, tpu.core_type = #tpu.core_type<tc>, window_params = [{transform_indices = @transform_0, window_bounds = array<i64: 4, 8, 8>}, {transform_indices = @transform_1, window_bounds = array<i64: 4, 8, 8>}, {transform_indices = @transform_2, window_bounds = array<i64: 4, 8, 8>}, {transform_indices = @transform_3, window_bounds = array<i64: 4, 8, 8>}, {transform_indices = @transform_4, window_bounds = array<i64: 4, 8, 8>}]} {
    %c0 = arith.constant 0 : index
    %c0_0 = arith.constant 0 : index
    %c0_1 = arith.constant 0 : index
    %0 = vector.load %arg1[%c0, %c0_0, %c0_1] : memref<4x8x8xf32, #tpu.memory_space<vmem>>, vector<4x8x8xf32>
    %c0_2 = arith.constant 0 : index
    %c0_3 = arith.constant 0 : index
    %c0_4 = arith.constant 0 : index
    %1 = vector.load %arg2[%c0_2, %c0_3, %c0_4] : memref<4x8x8xf32, #tpu.memory_space<vmem>>, vector<4x8x8xf32>
    %c0_5 = arith.constant 0 : index
    %c0_6 = arith.constant 0 : index
    %c0_7 = arith.constant 0 : index
    %2 = vector.load %arg3[%c0_5, %c0_6, %c0_7] : memref<4x8x8xf32, #tpu.memory_space<vmem>>, vector<4x8x8xf32>
    "tpu.trace_start"() <{level = 10 : i32, message = "hqd,hkd->hqk"}> : () -> ()
    %cst = arith.constant dense<0.000000e+00> : vector<4x8x8xf32>
    %3 = tpu.matmul %0, %1, %cst {dimension_numbers = #tpu.dot_dimension_numbers<[2], [2], [1], [1], [0, 0, 0, 1, 1, 1], [0], [0]>} : vector<4x8x8xf32>, vector<4x8x8xf32>, vector<4x8x8xf32> -> vector<4x8x8xf32>
    "tpu.trace_stop"() : () -> ()
    %cst_8 = arith.constant 0.353553385 : f32
    %4 = vector.broadcast %cst_8 : f32 to vector<4x8x8xf32>
    %5 = arith.mulf %3, %4 : vector<4x8x8xf32>
    %6 = tpu.iota {dimensions = array<i32: 1>} : vector<4x8x8xi32>
    %7 = tpu.iota {dimensions = array<i32: 2>} : vector<4x8x8xi32>
    %8 = arith.cmpi sle, %7, %6 : vector<4x8x8xi32>
    %cst_9 = arith.constant -1.000000e+30 : f32
    %9 = vector.broadcast %cst_9 : f32 to vector<4x8x8xf32>
    %10 = arith.select %8, %5, %9 : vector<4x8x8xi1>, vector<4x8x8xf32>
    %cst_10 = arith.constant dense<0xFF800000> : vector<4x8xf32>
    %11 = vector.multi_reduction <maximumf>, %10, %cst_10 [2] : vector<4x8x8xf32> to vector<4x8xf32>
    %12 = vector.shape_cast %11 : vector<4x8xf32> to vector<4x8x1xf32>
    %13 = vector.broadcast %12 : vector<4x8x1xf32> to vector<4x8x8xf32>
    %14 = arith.subf %10, %13 : vector<4x8x8xf32>
    %15 = math.exp %14 : vector<4x8x8xf32>
    %cst_11 = arith.constant dense<0.000000e+00> : vector<4x8xf32>
    %16 = vector.multi_reduction <add>, %15, %cst_11 [2] : vector<4x8x8xf32> to vector<4x8xf32>
    %17 = vector.shape_cast %16 : vector<4x8xf32> to vector<4x8x1xf32>
    %18 = tpu.reciprocal %17 {approx = true} : vector<4x8x1xf32> -> vector<4x8x1xf32>
    %19 = vector.broadcast %18 : vector<4x8x1xf32> to vector<4x8x8xf32>
    %20 = arith.mulf %15, %19 : vector<4x8x8xf32>
    "tpu.trace_start"() <{level = 10 : i32, message = "hqk,hkd->hqd"}> : () -> ()
    %cst_12 = arith.constant dense<0.000000e+00> : vector<4x8x8xf32>
    %21 = tpu.matmul %20, %2, %cst_12 {dimension_numbers = #tpu.dot_dimension_numbers<[2], [1], [1], [2], [0, 0, 0, 1, 1, 2], [0], [0]>} : vector<4x8x8xf32>, vector<4x8x8xf32>, vector<4x8x8xf32> -> vector<4x8x8xf32>
    "tpu.trace_stop"() : () -> ()
    %c0_13 = arith.constant 0 : index
    %c0_14 = arith.constant 0 : index
    %c0_15 = arith.constant 0 : index
    %22 = vector.load %arg4[%c0_13, %c0_14, %c0_15] : memref<4x8x8xf32, #tpu.memory_space<vmem>>, vector<4x8x8xf32>
    tpu.vector_store %arg4[%c0_13, %c0_14, %c0_15], %21 {strides = array<i32>} : memref<4x8x8xf32, #tpu.memory_space<vmem>>, vector<4x8x8xf32>,
    %c0_16 = arith.constant 0 : index
    %c0_17 = arith.constant 0 : index
    %c0_18 = arith.constant 0 : index
    %23 = vector.load %arg5[%c0_16, %c0_17, %c0_18] : memref<4x8x8xf32, #tpu.memory_space<vmem>>, vector<4x8x8xf32>
    tpu.vector_store %arg5[%c0_16, %c0_17, %c0_18], %20 {strides = array<i32>} : memref<4x8x8xf32, #tpu.memory_space<vmem>>, vector<4x8x8xf32>,
    return
  }
  func.func @transform_0(%arg0: i32) -> (i32, i32, i32) {
    %c0_i32 = arith.constant 0 : i32
    %c0_i32_0 = arith.constant 0 : i32
    %c0_i32_1 = arith.constant 0 : i32
    return %arg0, %c0_i32, %c0_i32_0 : i32, i32, i32
  }
  func.func @transform_1(%arg0: i32) -> (i32, i32, i32) {
    %c0_i32 = arith.constant 0 : i32
    %c0_i32_0 = arith.constant 0 : i32
    %c0_i32_1 = arith.constant 0 : i32
    return %arg0, %c0_i32, %c0_i32_0 : i32, i32, i32
  }
  func.func @transform_2(%arg0: i32) -> (i32, i32, i32) {
    %c0_i32 = arith.constant 0 : i32
    %c0_i32_0 = arith.constant 0 : i32
    %c0_i32_1 = arith.constant 0 : i32
    return %arg0, %c0_i32, %c0_i32_0 : i32, i32, i32
  }
  func.func @transform_3(%arg0: i32) -> (i32, i32, i32) {
    %c0_i32 = arith.constant 0 : i32
    %c0_i32_0 = arith.constant 0 : i32
    %c0_i32_1 = arith.constant 0 : i32
    return %arg0, %c0_i32, %c0_i32_0 : i32, i32, i32
  }
  func.func @transform_4(%arg0: i32) -> (i32, i32, i32) {
    %c0_i32 = arith.constant 0 : i32
    %c0_i32_0 = arith.constant 0 : i32
    %c0_i32_1 = arith.constant 0 : i32
    return %arg0, %c0_i32, %c0_i32_0 : i32, i32, i32
  }
}

</mosaic_0001>

<bundles_post_ra>
// kernel: gpt_encoder_forward.17
= control target key start
LH: loop header
LB: loop body
LE: loop exit
PB: predicated region body
PF: predicated region fallthrough
CT: control target
= control target key end

     0   :  { %vm28_vm0 = vcmask 261120   ;;  %s203_s1 = inlined_call_operand.vmem [shape: f32[32,128], index: 1, kind: input, shape index: {}]   ;;  %s204_s0 = inlined_call_operand.vmem [shape: f32[16,32], index: 0, kind: input, shape index: {}]   ;;  %s205_s2 = inlined_call_operand.vmem [shape: f32[1,128], index: 2, kind: input, shape index: {}]   ;;  %s206_s3 = inlined_call_operand.vmem [shape: f32[16,128], index: 3, kind: output, shape index: {}]  }
   0x1   :  { %v27_v0 = vld [vmem:[%s203_s1 + $0x18] sm:$0xff]  ;;  %v26_v1 = vld [vmem:[%s203_s1 + $0x10] sm:$0xff]  ;;  %v22_v2 = vld [vmem:[%s204_s0] sm:$0xff] }
   0x2   :  { %143 = vmatprep.subr.mxu0 %v27_v0  ;;  %v25_v3 = vld [vmem:[%s203_s1 + $0x8] sm:$0xff]  ;;  %151 = vmatprep.mubr.msk.f32.mxu0 %vm28_vm0, %v22_v2  ;;  %v24_v4 = vld [vmem:[%s203_s1] sm:$0xff] }
   0x3   :  { %144 = vmatpush3.msra.mxu0 %v27_v0  ;;  %v23_v5 = vld [vmem:[%s204_s0 + $0x8] sm:$0xff]  ;;  %v136_v6 = vld [vmem:[%s205_s2] ss:$0 sm:$0xff] }
   0x4   :  { %145 = vmatprep.subr.mxu0 %v26_v1 }
   0x5   :  { %146 = vmatpush3.msra.mxu0 %v26_v1 }
   0x6   :  { %147 = vmatprep.subr.mxu0 %v25_v3 }
   0x7   :  { %148 = vmatpush3.msra.mxu0 %v25_v3 }
   0x8   :  { %149 = vmatprep.subr.mxu0 %v24_v4 }
   0x9   :  { %150 = vmatpush3.msra.mxu0 %v24_v4 }
   0xa   :  { %152 = vmatmul.mubr.msk.f32.vlgmr.msra.gmra.mxu0 %vm28_vm0, %v23_v5 }
  0xca   :  { %v153_v7 = vpop.f32.mrf.mxu0 }
  0xcb   :  { %v127_v8 = vadd.f32 %v153_v7, %v136_v6 }
  0xcc   :  { %v101_v9 = vpop.f32.mrf.mxu0 }
  0xcd   :  { %129 = vst [vmem:[%s206_s3 + $0x8] sm:$0xff] %v127_v8  ;;  %v126_v10 = vadd.f32 %v136_v6, %v101_v9 }
  0xcf   :  { %128 = vst [vmem:[%s206_s3] sm:$0xff] %v126_v10 }

// kernel: gpt_encoder_forward.16
= control target key start
LH: loop header
LB: loop body
LE: loop exit
PB: predicated region body
PF: predicated region fallthrough
CT: control target
= control target key end

     0   :  { %vm16_vm0 = vcmask 261120   ;;  %s118_s0 = inlined_call_operand.vmem [shape: f32[16,32], index: 0, kind: input, shape index: {}]   ;;  %s119_s1 = inlined_call_operand.vmem [shape: f32[1,32], index: 1, kind: input, shape index: {}]   ;;  %s120_s2 = inlined_call_operand.vmem [shape: f32[1,32], index: 2, kind: input, shape index: {}]   ;;  %s121_s3 = inlined_call_operand.vmem [shape: f32[16,32], index: 3, kind: output, shape index: {}]  }
   0x1   :  { %v14_v0 = vld [vmem:[%s118_s0] sm:$0xff]  ;;  %v15_v1 = vld [vmem:[%s118_s0 + $0x8] sm:$0xff] }
   0x2   :  { %v17_v2 = vsel %vm16_vm0, %v14_v0, 0.0  ;;  %v20_v3 = vsel %vm16_vm0, %v15_v1, 0.0  ;;  %v68_v21 = vld [vmem:[%s119_s1] ss:$0 sm:$0xff] }
   0x3   :  { %18 = vadd.xlane.f32.xlu0 %v17_v2  ;;  %v69_v23 = vld [vmem:[%s120_s2] ss:$0 sm:$0xff] }
   0x7   :  { %21 = vadd.xlane.f32.xlu0 %v20_v3 }
  0x8c   :  { %v19_v4 = vpop.xlane.xlu0 %18 }
  0x8d   :  { %v24_v5 = vmul.f32 0.03125, %v19_v4 }
  0x8f   :  { %v26_v6 = vsub.f32 %v14_v0, %v24_v5 }
  0x90   :  { %v22_v7 = vpop.xlane.xlu0 %21 }
  0x91   :  { %v25_v8 = vmul.f32 0.03125, %v22_v7  ;;  %v28_v9 = vmul.f32 %v26_v6, %v26_v6 }
  0x93   :  { %v27_v10 = vsub.f32 %v15_v1, %v25_v8  ;;  %v30_v11 = vsel %vm16_vm0, %v28_v9, 0.0 }
  0x94   :  { %31 = vadd.xlane.f32.xlu1 %v30_v11 }
  0x95   :  { %v29_v12 = vmul.f32 %v27_v10, %v27_v10 }
  0x97   :  { %v33_v13 = vsel %vm16_vm0, %v29_v12, 0.0 }
  0x98   :  { %34 = vadd.xlane.f32.xlu1 %v33_v13 }
 0x11d   :  { %v32_v14 = vpop.xlane.xlu1 %31 }
 0x11e   :  { %v36_v15 = vmul.f32 0.03125, %v32_v14 }
 0x120   :  { %v38_v16 = vadd.f32 1e-05, %v36_v15 }
 0x121   :  { %v35_v17 = vpop.xlane.xlu1 %34 }
 0x122   :  { %70 = vrsqrt.f32 %v38_v16  ;;  %v37_v18 = vmul.f32 0.03125, %v35_v17 }
 0x124   :  { %v39_v19 = vadd.f32 1e-05, %v37_v18 }
 0x126   :  { %72 = vrsqrt.f32 %v39_v19 }
 0x12f   :  { %v71_v20 = vpop.eup %70 }
 0x130   :  { %v42_v22 = vmul.f32 %v71_v20, %v26_v6 }
 0x132   :  { %v51_v24 = vmul.f32 %v68_v21, %v42_v22 }
 0x133   :  { %v73_v25 = vpop.eup %72 }
 0x134   :  { %v60_v26 = vadd.f32 %v69_v23, %v51_v24  ;;  %v43_v27 = vmul.f32 %v73_v25, %v27_v10 }
 0x136   :  { %62 = vst.msk [vmem:[%s121_s3] sm:$0xff] %vm16_vm0, %v60_v26  ;;  %v52_v28 = vmul.f32 %v68_v21, %v43_v27 }
 0x138   :  { %v61_v29 = vadd.f32 %v69_v23, %v52_v28 }
 0x13a   :  { %63 = vst.msk [vmem:[%s121_s3 + $0x8] sm:$0xff] %vm16_vm0, %v61_v29 }

// kernel: gpt_encoder_forward.18
= control target key start
LH: loop header
LB: loop body
LE: loop exit
PB: predicated region body
PF: predicated region fallthrough
CT: control target
= control target key end

     0   :  { %s1107_s12 = smov 0   ;;  %s1188_s0 = inlined_call_operand.vmem [shape: f32[8,8,8], index: 0, kind: input, shape index: {}]   ;;  %s1189_s1 = inlined_call_operand.vmem [shape: f32[8,8,8], index: 1, kind: input, shape index: {}]   ;;  %s1190_s2 = inlined_call_operand.vmem [shape: f32[8,8,8], index: 2, kind: input, shape index: {}]   ;;  %s1191_s3 = inlined_call_operand.vmem [shape: f32[8,8,8], index: 3, kind: output, shape index: {}]  }
   0x1 LB: > { %s968_s13 = sadd.s32 4294967295, %s1083_s12   ;;  %p972_p0 = scmp.ge.s32.totalorder %s1083_s12, 1  ;;  %s1083_s12 = sphi %s1107_s12, %s13_s12  }
   0x2   : > { %p160_p1 = scmp.lt.s32.totalorder %s1083_s12, 3 }
   0x4   : > { %p161_p2 = pnand %p972_p0, %p160_p1 }
   0x5   : > { %s973_s14 = sshll.u32 (!%p161_p2), %s968_s13, 2 }
   0x6   : > { %164 = sbr.rel (%p161_p2) target bundleno = 729 (0x2d9), region = 32  ;;  %p195_p3 = scmp.lt.s32.totalorder (!%p161_p2), %s973_s14, 7 }
   0xb   : > { %v1085_v0 = vmov 0.0   ;;  %vm1086_vm0 = vmmov 0   ;;  %s1193_s14 = smov (!%p195_p3, %s973_s14), 7  ;;  %vm230_vm1 = vcmask 64512   ;;  %v539_v9 = vlaneseq }
   0xc   : > { %1011 = vmatprep.subr.mxu0 %v1085_v0  ;;  %1013 = vmatprep.mubr.msk.f32.mxu0 %vm1086_vm0, %v1085_v0  ;;  %s1121_s15 = sshll.u32 %s1193_s14, 3 }
   0xd   : > { %1016 = vmatprep.subr.mxu1 %v1085_v0  ;;  %1018 = vmatprep.mubr.msk.f32.mxu1 %vm1086_vm0, %v1085_v0  ;;  %s204_s18 = scalar_lea.vmem %s1189_s1, %s1121_s15  ;;  %s198_s21 = scalar_lea.vmem %s1188_s0, %s1121_s15  ;;  %v540_v10 = vshrl.u32 %v539_v9, 7  ;;  %v542_v11 = vand.u32 127, %v539_v9 }
   0xe   : > { %v222_v1 = vld [vmem:[%s204_s18] sm:$0xff]  ;;  %v223_v2 = vld [vmem:[%s204_s18 + $0x8] sm:$0xff]  ;;  %v224_v5 = vld [vmem:[%s204_s18 + $0x10] sm:$0xff]  ;;  %s210_s24 = scalar_lea.vmem %s1190_s2, %s1121_s15  ;;  %s216_s27 = scalar_lea.vmem %s1191_s3, %s1121_s15 }
   0xf   : > { %1012 = vmatpush3.xpose.msk.msra.mxu0 %vm230_vm1, %v222_v1  ;;  %v218_v3 = vld [vmem:[%s198_s21] sm:$0xff]  ;;  %1017 = vmatpush3.xpose.msk.msra.mxu1 %vm230_vm1, %v223_v2  ;;  %v219_v4 = vld [vmem:[%s198_s21 + $0x8] sm:$0xff]  ;;  %v225_v6 = vld [vmem:[%s204_s18 + $0x18] sm:$0xff]  ;;  %vm543_vm2 = vcmp.le.s32.totalorder %v542_v11, %v540_v10 }
  0x10   : > { %1021 = vmatprep.subr.mxu0 %v1085_v0  ;;  %1026 = vmatprep.subr.mxu1 %v1085_v0  ;;  %v220_v7 = vld [vmem:[%s198_s21 + $0x10] sm:$0xff]  ;;  %v221_v8 = vld [vmem:[%s198_s21 + $0x18] sm:$0xff]  ;;  %v226_v52 = vld [vmem:[%s210_s24] sm:$0xff] }
  0x11   : > { %v227_v53 = vld [vmem:[%s210_s24 + $0x8] sm:$0xff]  ;;  %v228_v60 = vld [vmem:[%s210_s24 + $0x10] sm:$0xff]  ;;  %v229_v1 = vld [vmem:[%s210_s24 + $0x18] sm:$0xff] }
  0x12   : > { %1014 = vmatmul.mubr.msk.f32.vlgmr.msra.gmra.mxu0 %vm230_vm1, %v218_v3  ;;  %1019 = vmatmul.mubr.msk.f32.vlgmr.msra.gmra.mxu1 %vm230_vm1, %v219_v4 }
  0x13   : > { %1022 = vmatpush3.xpose.msk.msra.mxu0 %vm230_vm1, %v224_v5  ;;  %1023 = vmatprep.mubr.msk.f32.mxu0 %vm1086_vm0, %v1085_v0 }
  0x14   : > { %1027 = vmatpush3.xpose.msk.msra.mxu1 %vm230_vm1, %v225_v6  ;;  %1028 = vmatprep.mubr.msk.f32.mxu1 %vm1086_vm0, %v1085_v0 }
  0x15   : > { %1031 = vmatprep.subr.mxu0 %v1085_v0  ;;  %1036 = vmatprep.subr.mxu1 %v1085_v0 }
  0x16   : > { %1024 = vmatmul.mubr.msk.f32.vlgmr.msra.gmra.mxu0 %vm230_vm1, %v220_v7 }
  0x17   : > { %1029 = vmatmul.mubr.msk.f32.vlgmr.msra.gmra.mxu1 %vm230_vm1, %v221_v8  ;;  %1033 = vmatprep.mubr.msk.f32.mxu0 %vm1086_vm0, %v1085_v0 }
  0x18   : > { %1038 = vmatprep.mubr.msk.f32.mxu1 %vm1086_vm0, %v1085_v0  ;;  %1032 = vmatpush3.msra.mxu0 %v226_v52 }
  0x19   : > { %1041 = vmatprep.subr.mxu0 %v1085_v0  ;;  %1037 = vmatpush3.msra.mxu1 %v227_v53 }
  0x1a   : > { %1046 = vmatprep.subr.mxu1 %v1085_v0 }
  0xd2   : > { %v303_v12 = vpop.f32.mrf.mxu0  ;;  %v379_v13 = vpop.f32.mrf.mxu1 }
  0xd3   : > { %v535_v14 = vmul.f32 0.35355338, %v303_v12  ;;  %v536_v15 = vmul.f32 0.35355338, %v379_v13 }
  0xd4   : > { %v1015_v16 = vpop.f32.mrf.mxu0  ;;  %v1020_v17 = vpop.f32.mrf.mxu1 }
  0xd5   : > { %v544_v18 = vsel %vm543_vm2, %v535_v14, -1e+30  ;;  %v545_v19 = vsel %vm543_vm2, %v536_v15, -1e+30 }
  0xd6   : > { %v455_v20 = vpop.f32.mrf.mxu0  ;;  %v548_v21 = vsel %vm230_vm1, %v544_v18, -inf  ;;  %v551_v26 = vsel %vm230_vm1, %v545_v19, -inf }
  0xd7   : > { %v537_v22 = vmul.f32 0.35355338, %v455_v20  ;;  %549 = vmax.xlane.f32.xlu0 %v548_v21  ;;  %v531_v23 = vpop.f32.mrf.mxu1 }
  0xd8   : > { %v1025_v24 = vpop.f32.mrf.mxu0  ;;  %v538_v25 = vmul.f32 0.35355338, %v531_v23 }
  0xd9   : > { %v1030_v27 = vpop.f32.mrf.mxu1  ;;  %v546_v28 = vsel %vm543_vm2, %v537_v22, -1e+30 }
  0xda   : > { %v554_v29 = vsel %vm230_vm1, %v546_v28, -inf  ;;  %v547_v30 = vsel %vm543_vm2, %v538_v25, -1e+30 }
  0xdb   : > { %552 = vmax.xlane.f32.xlu0 %v551_v26  ;;  %555 = vmax.xlane.f32.xlu1 %v554_v29  ;;  %v557_v31 = vsel %vm230_vm1, %v547_v30, -inf }
  0xdf   : > { %558 = vmax.xlane.f32.xlu1 %v557_v31 }
 0x160   : > { %v550_v32 = vpop.xlane.xlu0 %549 }
 0x161   : > { %v560_v33 = vsub.f32 %v544_v18, %v550_v32 }
 0x163   : > { %v564_v34 = vmul.f32 1.442695, %v560_v33 }
 0x164   : > { %v553_v35 = vpop.xlane.xlu0 %552  ;;  %v556_v36 = vpop.xlane.xlu1 %555 }
 0x165   : > { %1061 = vpow2.f32 %v564_v34  ;;  %v561_v37 = vsub.f32 %v545_v19, %v553_v35  ;;  %v562_v38 = vsub.f32 %v546_v28, %v556_v36 }
 0x167   : > { %v566_v39 = vmul.f32 1.442695, %v561_v37  ;;  %v568_v40 = vmul.f32 1.442695, %v562_v38 }
 0x168   : > { %v559_v41 = vpop.xlane.xlu1 %558 }
 0x169   : > { %1063 = vpow2.f32 %v566_v39  ;;  %v563_v42 = vsub.f32 %v547_v30, %v559_v41 }
 0x16a   : > { %1065 = vpow2.f32 %v568_v40 }
 0x16b   : > { %v570_v43 = vmul.f32 1.442695, %v563_v42 }
 0x16d   : > { %1067 = vpow2.f32 %v570_v43 }
 0x172   : > { %v1062_v44 = vpop.eup %1061 }
 0x173   : > { %v572_v45 = vsel %vm230_vm1, %v1062_v44, 0.0 }
 0x174   : > { %573 = vadd.xlane.f32.xlu0 %v572_v45 }
 0x176   : > { %v1064_v46 = vpop.eup %1063 }
 0x177   : > { %v1066_v47 = vpop.eup %1065  ;;  %v575_v48 = vsel %vm230_vm1, %v1064_v46, 0.0 }
 0x178   : > { %576 = vadd.xlane.f32.xlu1 %v575_v48  ;;  %v578_v49 = vsel %vm230_vm1, %v1066_v47, 0.0 }
 0x179   : > { %579 = vadd.xlane.f32.xlu0 %v578_v49 }
 0x17a   : > { %v1068_v50 = vpop.eup %1067 }
 0x17b   : > { %v581_v51 = vsel %vm230_vm1, %v1068_v50, 0.0 }
 0x17c   : > { %582 = vadd.xlane.f32.xlu1 %v581_v51 }
 0x1fd   : > { %v574_v54 = vpop.xlane.xlu0 %573 }
 0x1fe   : > { %1069 = vrcp.f32 %v574_v54 }
 0x201   : > { %v577_v55 = vpop.xlane.xlu1 %576 }
 0x202   : > { %v580_v56 = vpop.xlane.xlu0 %579  ;;  %1071 = vrcp.f32 %v577_v55 }
 0x203   : > { %1073 = vrcp.f32 %v580_v56 }
 0x205   : > { %v583_v57 = vpop.xlane.xlu1 %582 }
 0x206   : > { %1075 = vrcp.f32 %v583_v57 }
 0x20b   : > { %v1070_v58 = vpop.eup %1069 }
 0x20c   : > { %v588_v59 = vmul.f32 %v1070_v58, %v1062_v44 }
 0x20e   : > { %1034 = vmatmul.mubr.msk.f32.vlgmr.msra.gmra.mxu0 %vm230_vm1, %v588_v59 }
 0x20f   : > { %v1072_v61 = vpop.eup %1071  ;;  %1042 = vmatpush3.msra.mxu0 %v228_v60  ;;  %1043 = vmatprep.mubr.msk.f32.mxu0 %vm1086_vm0, %v1085_v0 }
 0x210   : > { %v1074_v62 = vpop.eup %1073  ;;  %v589_v63 = vmul.f32 %v1072_v61, %v1064_v46 }
 0x211   : > { %v590_v2 = vmul.f32 %v1074_v62, %v1066_v47 }
 0x212   : > { %1039 = vmatmul.mubr.msk.f32.vlgmr.msra.gmra.mxu1 %vm230_vm1, %v589_v63 }
 0x213   : > { %v1076_v3 = vpop.eup %1075  ;;  %1044 = vmatmul.mubr.msk.f32.vlgmr.msra.gmra.mxu0 %vm230_vm1, %v590_v2  ;;  %1047 = vmatpush3.msra.mxu1 %v229_v1 }
 0x214   : > { %1048 = vmatprep.mubr.msk.f32.mxu1 %vm1086_vm0, %v1085_v0  ;;  %v591_v4 = vmul.f32 %v1076_v3, %v1068_v50 }
 0x216   : > { %1049 = vmatmul.mubr.msk.f32.vlgmr.msra.gmra.mxu1 %vm230_vm1, %v591_v4 }
 0x2ce   : > { %v661_v5 = vpop.f32.mrf.mxu0 }
 0x2cf   : > { %884 = vst.msk [vmem:[%s216_s27] sm:$0xff] %vm230_vm1, %v661_v5 }
 0x2d0   : > { %v1035_v6 = vpop.f32.mrf.mxu0 }
 0x2d2   : > { %v734_v7 = vpop.f32.mrf.mxu1 }
 0x2d3   : > { %885 = vst.msk [vmem:[%s216_s27 + $0x8] sm:$0xff] %vm230_vm1, %v734_v7  ;;  %v807_v8 = vpop.f32.mrf.mxu0 }
 0x2d4   : > { %886 = vst.msk [vmem:[%s216_s27 + $0x10] sm:$0xff] %vm230_vm1, %v807_v8  ;;  %v1040_v9 = vpop.f32.mrf.mxu1 }
 0x2d5   : > { %v1045_v10 = vpop.f32.mrf.mxu0 }
 0x2d6   : > { %v880_v0 = vpop.f32.mrf.mxu1 }
 0x2d7   : > { %887 = vst.msk [vmem:[%s216_s27 + $0x18] sm:$0xff] %vm230_vm1, %v880_v0 }
 0x2d8   : > { %v1050_v11 = vpop.f32.mrf.mxu1 }
 0x2d9 PF: > { %s13_s12 = sadd.s32 1, %s1083_s12  }
 0x2da   : > { %p10_p4 = scmp.ge.s32.totalorder %s13_s12, 4  }
 0x2dc   :  { %12 = sbr.rel (!%p10_p4) target bundleno = 1 (0x1), region = 68 }

// kernel: gpt_encoder_forward.19
= control target key start
LH: loop header
LB: loop body
LE: loop exit
PB: predicated region body
PF: predicated region fallthrough
CT: control target
= control target key end

     0   :  { %vm31_vm0 = vcmask 261120   ;;  %s221_s1 = inlined_call_operand.vmem [shape: f32[32,128], index: 1, kind: input, shape index: {}]   ;;  %s222_s0 = inlined_call_operand.vmem [shape: f32[16,32], index: 0, kind: input, shape index: {}]   ;;  %s223_s2 = inlined_call_operand.vmem [shape: f32[1,128], index: 2, kind: input, shape index: {}]   ;;  %s224_s3 = inlined_call_operand.vmem [shape: f32[16,128], index: 3, kind: input, shape index: {}]   ;;  %s225_s4 = inlined_call_operand.vmem [shape: f32[16,128], index: 4, kind: output, shape index: {}]  }
   0x1   :  { %v30_v0 = vld [vmem:[%s221_s1 + $0x18] sm:$0xff]  ;;  %v29_v1 = vld [vmem:[%s221_s1 + $0x10] sm:$0xff]  ;;  %v25_v2 = vld [vmem:[%s222_s0] sm:$0xff] }
   0x2   :  { %150 = vmatprep.subr.mxu0 %v30_v0  ;;  %v28_v3 = vld [vmem:[%s221_s1 + $0x8] sm:$0xff]  ;;  %158 = vmatprep.mubr.msk.f32.mxu0 %vm31_vm0, %v25_v2  ;;  %v27_v4 = vld [vmem:[%s221_s1] sm:$0xff] }
   0x3   :  { %151 = vmatpush3.msra.mxu0 %v30_v0  ;;  %v26_v5 = vld [vmem:[%s222_s0 + $0x8] sm:$0xff]  ;;  %v143_v6 = vld [vmem:[%s223_s2] ss:$0 sm:$0xff] }
   0x4   :  { %152 = vmatprep.subr.mxu0 %v29_v1  ;;  %v132_v8 = vld [vmem:[%s224_s3 + $0x8] sm:$0xff]  ;;  %v131_v11 = vld [vmem:[%s224_s3] sm:$0xff] }
   0x5   :  { %153 = vmatpush3.msra.mxu0 %v29_v1 }
   0x6   :  { %154 = vmatprep.subr.mxu0 %v28_v3 }
   0x7   :  { %155 = vmatpush3.msra.mxu0 %v28_v3 }
   0x8   :  { %156 = vmatprep.subr.mxu0 %v27_v4 }
   0x9   :  { %157 = vmatpush3.msra.mxu0 %v27_v4 }
   0xa   :  { %159 = vmatmul.mubr.msk.f32.vlgmr.msra.gmra.mxu0 %vm31_vm0, %v26_v5 }
  0xca   :  { %v160_v7 = vpop.f32.mrf.mxu0 }
  0xcb   :  { %v130_v9 = vadd.f32 %v160_v7, %v143_v6 }
  0xcc   :  { %v104_v10 = vpop.f32.mrf.mxu0 }
  0xcd   :  { %v134_v12 = vadd.f32 %v132_v8, %v130_v9  ;;  %v129_v13 = vadd.f32 %v143_v6, %v104_v10 }
  0xcf   :  { %136 = vst [vmem:[%s225_s4 + $0x8] sm:$0xff] %v134_v12  ;;  %v133_v14 = vadd.f32 %v131_v11, %v129_v13 }
  0xd1   :  { %135 = vst [vmem:[%s225_s4] sm:$0xff] %v133_v14 }

// kernel: gpt_encoder_forward.22
= control target key start
LH: loop header
LB: loop body
LE: loop exit
PB: predicated region body
PF: predicated region fallthrough
CT: control target
= control target key end

     0   :  { %s294_s1 = inlined_call_operand.vmem [shape: f32[128,128], index: 1, kind: input, shape index: {}]   ;;  %s295_s0 = inlined_call_operand.vmem [shape: f32[16,128], index: 0, kind: input, shape index: {}]   ;;  %s296_s2 = inlined_call_operand.vmem [shape: f32[1,128], index: 2, kind: input, shape index: {}]   ;;  %s297_s3 = inlined_call_operand.vmem [shape: f32[16,128], index: 3, kind: input, shape index: {}]   ;;  %s298_s4 = inlined_call_operand.vmem [shape: f32[16,128], index: 4, kind: output, shape index: {}]  }
   0x1   :  { %v42_v0 = vld [vmem:[%s294_s1 + $0x78] sm:$0xff]  ;;  %v41_v1 = vld [vmem:[%s294_s1 + $0x70] sm:$0xff]  ;;  %v40_v2 = vld [vmem:[%s294_s1 + $0x68] sm:$0xff] }
   0x2   :  { %165 = vmatprep.subr.mxu0 %v42_v0  ;;  %v39_v3 = vld [vmem:[%s294_s1 + $0x60] sm:$0xff]  ;;  %v38_v5 = vld [vmem:[%s294_s1 + $0x58] sm:$0xff]  ;;  %v37_v6 = vld [vmem:[%s294_s1 + $0x50] sm:$0xff] }
   0x3   :  { %166 = vmatpush3.msra.mxu0 %v42_v0  ;;  %v25_v4 = vld [vmem:[%s295_s0] sm:$0xff]  ;;  %v36_v7 = vld [vmem:[%s294_s1 + $0x48] sm:$0xff]  ;;  %v34_v9 = vld [vmem:[%s294_s1 + $0x38] sm:$0xff] }
   0x4   :  { %167 = vmatprep.subr.mxu0 %v41_v1  ;;  %197 = vmatprep.mubr.f32.mxu0 %v25_v4  ;;  %v35_v8 = vld [vmem:[%s294_s1 + $0x40] sm:$0xff]  ;;  %v33_v10 = vld [vmem:[%s294_s1 + $0x30] sm:$0xff]  ;;  %v32_v11 = vld [vmem:[%s294_s1 + $0x28] sm:$0xff] }
   0x5   :  { %168 = vmatpush3.msra.mxu0 %v41_v1  ;;  %v31_v12 = vld [vmem:[%s294_s1 + $0x20] sm:$0xff]  ;;  %v30_v13 = vld [vmem:[%s294_s1 + $0x18] sm:$0xff]  ;;  %v29_v14 = vld [vmem:[%s294_s1 + $0x10] sm:$0xff] }
   0x6   :  { %169 = vmatprep.subr.mxu0 %v40_v2  ;;  %v28_v15 = vld [vmem:[%s294_s1 + $0x8] sm:$0xff]  ;;  %v27_v16 = vld [vmem:[%s294_s1] sm:$0xff] }
   0x7   :  { %170 = vmatpush3.msra.mxu0 %v40_v2  ;;  %v26_v17 = vld [vmem:[%s295_s0 + $0x8] sm:$0xff]  ;;  %v146_v18 = vld [vmem:[%s296_s2] ss:$0 sm:$0xff] }
   0x8   :  { %171 = vmatprep.subr.mxu0 %v39_v3  ;;  %v137_v20 = vld [vmem:[%s297_s3 + $0x8] sm:$0xff]  ;;  %v136_v23 = vld [vmem:[%s297_s3] sm:$0xff] }
   0x9   :  { %172 = vmatpush3.msra.mxu0 %v39_v3 }
   0xa   :  { %173 = vmatprep.subr.mxu0 %v38_v5 }
   0xb   :  { %174 = vmatpush3.msra.mxu0 %v38_v5 }
   0xc   :  { %175 = vmatprep.subr.mxu0 %v37_v6 }
   0xd   :  { %176 = vmatpush3.msra.mxu0 %v37_v6 }
   0xe   :  { %177 = vmatprep.subr.mxu0 %v36_v7 }
   0xf   :  { %178 = vmatpush3.msra.mxu0 %v36_v7 }
  0x10   :  { %179 = vmatprep.subr.mxu0 %v35_v8 }
  0x11   :  { %180 = vmatpush3.msra.mxu0 %v35_v8 }
  0x12   :  { %181 = vmatprep.subr.mxu0 %v34_v9 }
  0x13   :  { %182 = vmatpush3.msra.mxu0 %v34_v9 }
  0x14   :  { %183 = vmatprep.subr.mxu0 %v33_v10 }
  0x15   :  { %184 = vmatpush3.msra.mxu0 %v33_v10 }
  0x16   :  { %185 = vmatprep.subr.mxu0 %v32_v11 }
  0x17   :  { %186 = vmatpush3.msra.mxu0 %v32_v11 }
  0x18   :  { %187 = vmatprep.subr.mxu0 %v31_v12 }
  0x19   :  { %188 = vmatpush3.msra.mxu0 %v31_v12 }
  0x1a   :  { %189 = vmatprep.subr.mxu0 %v30_v13 }
  0x1b   :  { %190 = vmatpush3.msra.mxu0 %v30_v13 }
  0x1c   :  { %191 = vmatprep.subr.mxu0 %v29_v14 }
  0x1d   :  { %192 = vmatpush3.msra.mxu0 %v29_v14 }
  0x1e   :  { %193 = vmatprep.subr.mxu0 %v28_v15 }
  0x1f   :  { %194 = vmatpush3.msra.mxu0 %v28_v15 }
  0x20   :  { %195 = vmatprep.subr.mxu0 %v27_v16 }
  0x21   :  { %196 = vmatpush3.msra.mxu0 %v27_v16 }
  0x22   :  { %198 = vmatmul.mubr.f32.vlgmr.msra.gmra.mxu0 %v26_v17 }
  0xe2   :  { %v199_v19 = vpop.f32.mrf.mxu0 }
  0xe3   :  { %v135_v21 = vadd.f32 %v199_v19, %v146_v18 }
  0xe4   :  { %v109_v22 = vpop.f32.mrf.mxu0 }
  0xe5   :  { %v139_v24 = vadd.f32 %v137_v20, %v135_v21  ;;  %v134_v25 = vadd.f32 %v146_v18, %v109_v22 }
  0xe7   :  { %141 = vst [vmem:[%s298_s4 + $0x8] sm:$0xff] %v139_v24  ;;  %v138_v26 = vadd.f32 %v136_v23, %v134_v25 }
  0xe9   :  { %140 = vst [vmem:[%s298_s4] sm:$0xff] %v138_v26 }

// kernel: gpt_encoder_forward.21
= control target key start
LH: loop header
LB: loop body
LE: loop exit
PB: predicated region body
PF: predicated region fallthrough
CT: control target
= control target key end

     0   :  { %vm28_vm0 = vcmask 261120   ;;  %s225_s1 = inlined_call_operand.vmem [shape: f32[32,128], index: 1, kind: input, shape index: {}]   ;;  %s226_s0 = inlined_call_operand.vmem [shape: f32[16,32], index: 0, kind: input, shape index: {}]   ;;  %s227_s2 = inlined_call_operand.vmem [shape: f32[1,128], index: 2, kind: input, shape index: {}]   ;;  %s228_s3 = inlined_call_operand.vmem [shape: f32[16,128], index: 3, kind: output, shape index: {}]  }
   0x1   :  { %v27_v0 = vld [vmem:[%s225_s1 + $0x18] sm:$0xff]  ;;  %v26_v1 = vld [vmem:[%s225_s1 + $0x10] sm:$0xff]  ;;  %v22_v2 = vld [vmem:[%s226_s0] sm:$0xff] }
   0x2   :  { %161 = vmatprep.subr.mxu0 %v27_v0  ;;  %v25_v3 = vld [vmem:[%s225_s1 + $0x8] sm:$0xff]  ;;  %169 = vmatprep.mubr.msk.f32.mxu0 %vm28_vm0, %v22_v2  ;;  %v24_v4 = vld [vmem:[%s225_s1] sm:$0xff] }
   0x3   :  { %162 = vmatpush3.msra.mxu0 %v27_v0  ;;  %v23_v5 = vld [vmem:[%s226_s0 + $0x8] sm:$0xff]  ;;  %v154_v6 = vld [vmem:[%s227_s2] ss:$0 sm:$0xff] }
   0x4   :  { %163 = vmatprep.subr.mxu0 %v26_v1 }
   0x5   :  { %164 = vmatpush3.msra.mxu0 %v26_v1 }
   0x6   :  { %165 = vmatprep.subr.mxu0 %v25_v3 }
   0x7   :  { %166 = vmatpush3.msra.mxu0 %v25_v3 }
   0x8   :  { %167 = vmatprep.subr.mxu0 %v24_v4 }
   0x9   :  { %168 = vmatpush3.msra.mxu0 %v24_v4 }
   0xa   :  { %170 = vmatmul.mubr.msk.f32.vlgmr.msra.gmra.mxu0 %vm28_vm0, %v23_v5 }
  0xca   :  { %v171_v7 = vpop.f32.mrf.mxu0 }
  0xcb   :  { %v127_v8 = vadd.f32 %v171_v7, %v154_v6 }
  0xcc   :  { %v101_v9 = vpop.f32.mrf.mxu0 }
  0xcd   :  { %v131_v10 = vmul.f32 0.044715, %v127_v8  ;;  %v126_v11 = vadd.f32 %v154_v6, %v101_v9  ;;  %v129_v22 = vmul.f32 0.5, %v127_v8 }
  0xcf   :  { %v133_v12 = vmul.f32 %v131_v10, %v127_v8  ;;  %v130_v13 = vmul.f32 0.044715, %v126_v11  ;;  %v128_v26 = vmul.f32 0.5, %v126_v11 }
  0xd1   :  { %v135_v14 = vmul.f32 %v133_v12, %v127_v8  ;;  %v132_v15 = vmul.f32 %v130_v13, %v126_v11 }
  0xd3   :  { %v137_v16 = vadd.f32 %v135_v14, %v127_v8  ;;  %v134_v17 = vmul.f32 %v132_v15, %v126_v11 }
  0xd5   :  { %v139_v18 = vmul.f32 0.7978846, %v137_v16  ;;  %v136_v19 = vadd.f32 %v134_v17, %v126_v11 }
  0xd7   :  { %172 = vtanh.f32 %v139_v18  ;;  %v138_v20 = vmul.f32 0.7978846, %v136_v19 }
  0xd9   :  { %174 = vtanh.f32 %v138_v20 }
  0xe4   :  { %v173_v21 = vpop.eup %172 }
  0xe5   :  { %v143_v23 = vadd.f32 1.0, %v173_v21 }
  0xe6   :  { %v175_v24 = vpop.eup %174 }
  0xe7   :  { %v145_v25 = vmul.f32 %v143_v23, %v129_v22  ;;  %v142_v27 = vadd.f32 1.0, %v175_v24 }
  0xe9   :  { %147 = vst [vmem:[%s228_s3 + $0x8] sm:$0xff] %v145_v25  ;;  %v144_v28 = vmul.f32 %v142_v27, %v128_v26 }
  0xeb   :  { %146 = vst [vmem:[%s228_s3] sm:$0xff] %v144_v28 }

// kernel: gpt_encoder_forward.25
= control target key start
LH: loop header
LB: loop body
LE: loop exit
PB: predicated region body
PF: predicated region fallthrough
CT: control target
= control target key end

     0   :  { %10 = vsyncpa [#allocation3], 0  ;;  %s1479_s0 = inlined_call_operand.vmem [shape: f32[8,8,8], index: 0, kind: input, shape index: {}]   ;;  %s1480_s1 = inlined_call_operand.vmem [shape: f32[8,8,8], index: 1, kind: input, shape index: {}]   ;;  %s1481_s2 = inlined_call_operand.vmem [shape: f32[8,8,8], index: 2, kind: input, shape index: {}]   ;;  %s1482_s3 = inlined_call_operand.vmem [shape: f32[8,8,8], index: 3, kind: output, shape index: {0}]   ;;  %s1483_s4 = inlined_call_operand.hbm [shape: f32[8,8,8], index: 4, kind: output, shape index: {1}]  }
   0x1   :  { %12 = vsyncpa [#allocation3 + $0x1], 0  ;;  %s1303_s15 = smov 0   ;;  %s1305_s16 = smov 0  }
   0x2   :  { %s1307_s17 = smov 0   ;;  %s1309_s18 = smov 0  }
   0x3 LB: > { %s1324_s19 = sadd.s32 4294967295, %s1271_s18   ;;  %s1065_s20 = sadd.s32 4294967294, %s1271_s18   ;;  %s1271_s18 = sphi %s1309_s18, %s1489_s18   ;;  %s1267_s17 = sphi %s1307_s17, %s1488_s17   ;;  %s1263_s16 = sphi %s1305_s16, %s1487_s16   ;;  %s1259_s15 = sphi %s1303_s15, %s1486_s15  }
   0x4   : > { %s1328_s21 = sadd.s32 1, %s1271_s18   ;;  %s129_s22 = sadd.s32 1, %s1267_s17 }
   0x5   : > { %s126_s23 = ssub.s32 %s1271_s18, %s1328_s21  ;;  %p139_p0 = scmp.ne.s32.totalorder %s1267_s17, %s1263_s16 }
   0x6   : > { %p127_p1 = scmp.eq.s32.totalorder %s126_s23, 0  ;;  %p140_p2 = scmp.eq.s32.totalorder %s1324_s19, 1 }
   0x7   : > { %p145_p3 = scmp.ne.s32.totalorder %s1263_s16, %s1259_s15  ;;  %p146_p4 = scmp.eq.s32.totalorder %s1065_s20, 1 }
   0x8   : > { %s1339_s24 = scalar_select %p127_p1, %s1267_s17, %s129_s22  }
   0x9   : > { %p1341_p5 = por %p140_p2, %p139_p0  ;;  %p1345_p6 = por %p146_p4, %p145_p3 }
   0xa   : > { %p1068_p7 = scmp.ge.s32.totalorder %s1271_s18, 1  ;;  %p191_p8 = scmp.lt.s32.totalorder %s1271_s18, 3 }
   0xc   : > { %p192_p9 = pnand %p1068_p7, %p191_p8 }
   0xd   : > { %s1070_s27 = sshll.u32 (!%p192_p9), %s1324_s19, 2  ;;  %s229_s12 = sand.u32 (!%p192_p9), 1, %s1263_s16  }
   0xe   : > { %195 = sbr.rel (%p192_p9) target bundleno = 737 (0x2e1), region = 32  ;;  %p233_p10 = scmp.lt.s32.totalorder (!%p192_p9), %s1070_s27, 7 }
   0xf   : > { %s1069_s13 = sshll.u32 (!%p192_p9), %s229_s12, 5  ;;  %s1095_s20 = sshll.u32 (!%p192_p9), %s1324_s19, 9 }
  0x10   : > { %s231_s14 = scalar_lea.vmem (!%p192_p9), [#allocation2], %s1069_s13  ;;  %s1425_s29 = scalar_lea.hbm (!%p192_p9), %s1483_s4, %s1095_s20 }
  0x11   : > { %s954_s22 = sshll.u32 (!%p192_p9), %s231_s14, 4  ;;  %s1431_s30 = scalar_lea.sflag (!%p192_p9), [#allocation3], %s229_s12  ;;  %s1427_s22 = int_to_ptr.vmem [resolvable:$true] %s954_s22 }
  0x12   : > { %s1275_s19 = smov (!%p192_p9), [#allocation2]  }
  0x13   : > { %v1273_v0 = vmov 0.0   ;;  %vm1274_vm0 = vmmov 0   ;;  %s1491_s27 = smov (!%p233_p10, %s1070_s27), 7  ;;  %vm269_vm1 = vcmask 64512   ;;  %v578_v9 = vlaneseq  ;;  %s1215_s6 = sshll.u32 %s1275_s19, 4  ;;  %s1216_s6 = int_to_ptr.vmem [resolvable:$false] %s1215_s6 }
  0x14   : > { %1112 = vmatprep.subr.mxu0 %v1273_v0  ;;  %1114 = vmatprep.mubr.msk.f32.mxu0 %vm1274_vm0, %v1273_v0  ;;  %s1358_s28 = sshll.u32 %s1491_s27, 3  ;;  %s1217_s7 = scalar_lea.vmem %s1216_s6, 1024 }
  0x15   : > { %1117 = vmatprep.subr.mxu1 %v1273_v0  ;;  %1119 = vmatprep.mubr.msk.f32.mxu1 %vm1274_vm0, %v1273_v0  ;;  %s242_s5 = scalar_lea.vmem %s1480_s1, %s1358_s28  ;;  %s236_s8 = scalar_lea.vmem %s1479_s0, %s1358_s28  ;;  %v579_v10 = vshrl.u32 %v578_v9, 7  ;;  %v581_v11 = vand.u32 127, %v578_v9 }
  0x16   : > { %v261_v1 = vld [vmem:[%s242_s5] sm:$0xff]  ;;  %v262_v2 = vld [vmem:[%s242_s5 + $0x8] sm:$0xff]  ;;  %v263_v5 = vld [vmem:[%s242_s5 + $0x10] sm:$0xff]  ;;  %s248_s11 = scalar_lea.vmem %s1481_s2, %s1358_s28  ;;  %p1218_p0 = scmp.lt.s32.totalorder %s1427_s22, %s1216_s6 }
  0x17   : > { %1113 = vmatpush3.xpose.msk.msra.mxu0 %vm269_vm1, %v261_v1  ;;  %v257_v3 = vld [vmem:[%s236_s8] sm:$0xff]  ;;  %1118 = vmatpush3.xpose.msk.msra.mxu1 %vm269_vm1, %v262_v2  ;;  %v258_v4 = vld [vmem:[%s236_s8 + $0x8] sm:$0xff]  ;;  %v264_v6 = vld [vmem:[%s242_s5 + $0x18] sm:$0xff]  ;;  %vm582_vm2 = vcmp.le.s32.totalorder %v581_v11, %v579_v10  ;;  %s1211_s5 = scalar_lea.vmem %s1427_s22, 512 }
  0x18   : > { %1122 = vmatprep.subr.mxu0 %v1273_v0  ;;  %1127 = vmatprep.subr.mxu1 %v1273_v0  ;;  %v259_v7 = vld [vmem:[%s236_s8 + $0x10] sm:$0xff]  ;;  %v260_v8 = vld [vmem:[%s236_s8 + $0x18] sm:$0xff]  ;;  %v265_v52 = vld [vmem:[%s248_s11] sm:$0xff]  ;;  %p1212_p11 = scmp.ne.s32.totalorder %s1427_s22, %s1211_s5  ;;  %p1219_p1 = scmp.lt.s32.totalorder %s1217_s7, %s1211_s5 }
  0x19   : > { %v266_v53 = vld [vmem:[%s248_s11 + $0x8] sm:$0xff]  ;;  %v267_v60 = vld [vmem:[%s248_s11 + $0x10] sm:$0xff]  ;;  %v268_v1 = vld [vmem:[%s248_s11 + $0x18] sm:$0xff] }
  0x1a   : > { %1115 = vmatmul.mubr.msk.f32.vlgmr.msra.gmra.mxu0 %vm269_vm1, %v257_v3  ;;  %1120 = vmatmul.mubr.msk.f32.vlgmr.msra.gmra.mxu1 %vm269_vm1, %v258_v4  ;;  %p1213_p12 = pnand %p1212_p11, %p1341_p5  ;;  %p1220_p2 = por %p1219_p1, %p1218_p0 }
  0x1b   : > { %1123 = vmatpush3.xpose.msk.msra.mxu0 %vm269_vm1, %v263_v5  ;;  %1124 = vmatprep.mubr.msk.f32.mxu0 %vm1274_vm0, %v1273_v0 }
  0x1c   : > { %1128 = vmatpush3.xpose.msk.msra.mxu1 %vm269_vm1, %v264_v6  ;;  %1129 = vmatprep.mubr.msk.f32.mxu1 %vm1274_vm0, %v1273_v0  ;;  %p1214_p13 = pneg %p1213_p12 }
  0x1d   : > { %1132 = vmatprep.subr.mxu0 %v1273_v0  ;;  %1137 = vmatprep.subr.mxu1 %v1273_v0 }
  0x1e   : > { %1125 = vmatmul.mubr.msk.f32.vlgmr.msra.gmra.mxu0 %vm269_vm1, %v259_v7  ;;  %p1221_p3 = pnand %p1220_p2, %p1214_p13 }
  0x1f   : > { %1130 = vmatmul.mubr.msk.f32.vlgmr.msra.gmra.mxu1 %vm269_vm1, %v260_v8  ;;  %1134 = vmatprep.mubr.msk.f32.mxu0 %vm1274_vm0, %v1273_v0 }
  0x20   : > { %1139 = vmatprep.mubr.msk.f32.mxu1 %vm1274_vm0, %v1273_v0  ;;  %1133 = vmatpush3.msra.mxu0 %v265_v52 }
  0x21   : > { %1142 = vmatprep.subr.mxu0 %v1273_v0  ;;  %1138 = vmatpush3.msra.mxu1 %v266_v53 }
  0x22   : > { %1147 = vmatprep.subr.mxu1 %v1273_v0 }
  0xda   : > { %v342_v12 = vpop.f32.mrf.mxu0  ;;  %v418_v13 = vpop.f32.mrf.mxu1 }
  0xdb   : > { %v574_v14 = vmul.f32 0.35355338, %v342_v12  ;;  %v575_v15 = vmul.f32 0.35355338, %v418_v13 }
  0xdc   : > { %v1116_v16 = vpop.f32.mrf.mxu0  ;;  %v1121_v17 = vpop.f32.mrf.mxu1 }
  0xdd   : > { %v583_v18 = vsel %vm582_vm2, %v574_v14, -1e+30  ;;  %v584_v19 = vsel %vm582_vm2, %v575_v15, -1e+30 }
  0xde   : > { %v494_v20 = vpop.f32.mrf.mxu0  ;;  %v587_v21 = vsel %vm269_vm1, %v583_v18, -inf  ;;  %v590_v26 = vsel %vm269_vm1, %v584_v19, -inf }
  0xdf   : > { %v576_v22 = vmul.f32 0.35355338, %v494_v20  ;;  %588 = vmax.xlane.f32.xlu0 %v587_v21  ;;  %v570_v23 = vpop.f32.mrf.mxu1 }
  0xe0   : > { %v1126_v24 = vpop.f32.mrf.mxu0  ;;  %v577_v25 = vmul.f32 0.35355338, %v570_v23 }
  0xe1   : > { %v1131_v27 = vpop.f32.mrf.mxu1  ;;  %v585_v28 = vsel %vm582_vm2, %v576_v22, -1e+30 }
  0xe2   : > { %v593_v29 = vsel %vm269_vm1, %v585_v28, -inf  ;;  %v586_v30 = vsel %vm582_vm2, %v577_v25, -1e+30 }
  0xe3   : > { %591 = vmax.xlane.f32.xlu0 %v590_v26  ;;  %594 = vmax.xlane.f32.xlu1 %v593_v29  ;;  %v596_v31 = vsel %vm269_vm1, %v586_v30, -inf }
  0xe7   : > { %597 = vmax.xlane.f32.xlu1 %v596_v31 }
 0x168   : > { %v589_v32 = vpop.xlane.xlu0 %588 }
 0x169   : > { %v599_v33 = vsub.f32 %v583_v18, %v589_v32 }
 0x16b   : > { %v603_v34 = vmul.f32 1.442695, %v599_v33 }
 0x16c   : > { %v592_v35 = vpop.xlane.xlu0 %591  ;;  %v595_v36 = vpop.xlane.xlu1 %594 }
 0x16d   : > { %1195 = vpow2.f32 %v603_v34  ;;  %v600_v37 = vsub.f32 %v584_v19, %v592_v35  ;;  %v601_v38 = vsub.f32 %v585_v28, %v595_v36 }
 0x16f   : > { %v605_v39 = vmul.f32 1.442695, %v600_v37  ;;  %v607_v40 = vmul.f32 1.442695, %v601_v38 }
 0x170   : > { %v598_v41 = vpop.xlane.xlu1 %597 }
 0x171   : > { %1197 = vpow2.f32 %v605_v39  ;;  %v602_v42 = vsub.f32 %v586_v30, %v598_v41 }
 0x172   : > { %1199 = vpow2.f32 %v607_v40 }
 0x173   : > { %v609_v43 = vmul.f32 1.442695, %v602_v42 }
 0x175   : > { %1201 = vpow2.f32 %v609_v43 }
 0x17a   : > { %v1196_v44 = vpop.eup %1195 }
 0x17b   : > { %v611_v45 = vsel %vm269_vm1, %v1196_v44, 0.0 }
 0x17c   : > { %612 = vadd.xlane.f32.xlu0 %v611_v45 }
 0x17e   : > { %v1198_v46 = vpop.eup %1197 }
 0x17f   : > { %v1200_v47 = vpop.eup %1199  ;;  %v614_v48 = vsel %vm269_vm1, %v1198_v46, 0.0 }
 0x180   : > { %615 = vadd.xlane.f32.xlu1 %v614_v48  ;;  %v617_v49 = vsel %vm269_vm1, %v1200_v47, 0.0 }
 0x181   : > { %618 = vadd.xlane.f32.xlu0 %v617_v49 }
 0x182   : > { %v1202_v50 = vpop.eup %1201 }
 0x183   : > { %v620_v51 = vsel %vm269_vm1, %v1202_v50, 0.0 }
 0x184   : > { %621 = vadd.xlane.f32.xlu1 %v620_v51 }
 0x205   : > { %v613_v54 = vpop.xlane.xlu0 %612 }
 0x206   : > { %1203 = vrcp.f32 %v613_v54 }
 0x209   : > { %v616_v55 = vpop.xlane.xlu1 %615 }
 0x20a   : > { %v619_v56 = vpop.xlane.xlu0 %618  ;;  %1205 = vrcp.f32 %v616_v55 }
 0x20b   : > { %1207 = vrcp.f32 %v619_v56 }
 0x20d   : > { %v622_v57 = vpop.xlane.xlu1 %621 }
 0x20e   : > { %1209 = vrcp.f32 %v622_v57 }
 0x213   : > { %v1204_v58 = vpop.eup %1203 }
 0x214   : > { %v627_v59 = vmul.f32 %v1204_v58, %v1196_v44 }
 0x216   : > { %1135 = vmatmul.mubr.msk.f32.vlgmr.msra.gmra.mxu0 %vm269_vm1, %v627_v59  ;;  %927 = vst.msk [vmem:[%s231_s14] sm:$0xff] %vm269_vm1, %v627_v59 }
 0x217   : > { %v1206_v61 = vpop.eup %1205  ;;  %1143 = vmatpush3.msra.mxu0 %v267_v60  ;;  %1144 = vmatprep.mubr.msk.f32.mxu0 %vm1274_vm0, %v1273_v0 }
 0x218   : > { %v1208_v62 = vpop.eup %1207  ;;  %v628_v63 = vmul.f32 %v1206_v61, %v1198_v46 }
 0x219   : > { %v629_v2 = vmul.f32 %v1208_v62, %v1200_v47 }
 0x21a   : > { %1140 = vmatmul.mubr.msk.f32.vlgmr.msra.gmra.mxu1 %vm269_vm1, %v628_v63  ;;  %928 = vst.msk [vmem:[%s231_s14 + $0x8] sm:$0xff] %vm269_vm1, %v628_v63 }
 0x21b   : > { %v1210_v3 = vpop.eup %1209  ;;  %1145 = vmatmul.mubr.msk.f32.vlgmr.msra.gmra.mxu0 %vm269_vm1, %v629_v2  ;;  %929 = vst.msk [vmem:[%s231_s14 + $0x10] sm:$0xff] %vm269_vm1, %v629_v2  ;;  %1148 = vmatpush3.msra.mxu1 %v268_v1 }
 0x21c   : > { %1149 = vmatprep.mubr.msk.f32.mxu1 %vm1274_vm0, %v1273_v0  ;;  %v630_v4 = vmul.f32 %v1210_v3, %v1202_v50 }
 0x21e   : > { %1150 = vmatmul.mubr.msk.f32.vlgmr.msra.gmra.mxu1 %vm269_vm1, %v630_v4  ;;  %930 = vst.msk [vmem:[%s231_s14 + $0x18] sm:$0xff] %vm269_vm1, %v630_v4 }
 0x21f   : > { %1224 = shalt.err (!%p1221_p3)
}
 0x220   : > { %s1225_s8 = scalar_lea.hbm %s1425_s29, 512  ;;  %s1229_s11 = scalar_lea.hbm %s1483_s4, 1024 }
 0x221   : > { %p1226_p4 = scmp.ne.s32.totalorder %s1425_s29, %s1225_s8  ;;  %p1230_p9 = scmp.lt.s32.totalorder %s1425_s29, %s1483_s4 }
 0x222   : > { %p1231_p10 = scmp.lt.s32.totalorder %s1229_s11, %s1225_s8 }
 0x223   : > { %p1227_p7 = pnand %p1226_p4, %p1341_p5 }
 0x224   : > { %p1232_p11 = por %p1231_p10, %p1230_p9 }
 0x225   : > { %p1228_p8 = pneg %p1227_p7 }
 0x227   : > { %p1233_p12 = pnand %p1232_p11, %p1228_p8 }
 0x229   : > { %1236 = shalt.err (!%p1233_p12)
}
 0x22a   : > { %s1276_s14 = smov 128   ;;  %s1277_s20 = smov 8  }
 0x22b   : > { %1152 = dma.vmem_to_hbm [thread:$0]  (%p1341_p5), %s1427_s22, 512, %s1425_s29, %s1431_s30, %s1276_s14, %s1276_s14, %s1277_s20  }
 0x22c   : > { %s254_s5 = scalar_lea.vmem %s1482_s3, %s1358_s28 }
 0x2d6   : > { %v700_v0 = vpop.f32.mrf.mxu0 }
 0x2d7   : > { %923 = vst.msk [vmem:[%s254_s5] sm:$0xff] %vm269_vm1, %v700_v0 }
 0x2d8   : > { %v1136_v5 = vpop.f32.mrf.mxu0 }
 0x2da   : > { %v773_v6 = vpop.f32.mrf.mxu1 }
 0x2db   : > { %924 = vst.msk [vmem:[%s254_s5 + $0x8] sm:$0xff] %vm269_vm1, %v773_v6  ;;  %v846_v7 = vpop.f32.mrf.mxu0 }
 0x2dc   : > { %925 = vst.msk [vmem:[%s254_s5 + $0x10] sm:$0xff] %vm269_vm1, %v846_v7  ;;  %v1141_v8 = vpop.f32.mrf.mxu1 }
 0x2dd   : > { %v1146_v9 = vpop.f32.mrf.mxu0 }
 0x2de   : > { %v919_v10 = vpop.f32.mrf.mxu1 }
 0x2df   : > { %926 = vst.msk [vmem:[%s254_s5 + $0x18] sm:$0xff] %vm269_vm1, %v919_v10 }
 0x2e0   : > { %v1151_v11 = vpop.f32.mrf.mxu1 }
 0x2e1 PF: > { %p1158_p5 = scmp.ge.s32.totalorder %s1271_s18, 2  ;;  %s977_s25 = sand.u32 1, %s1259_s15  }
 0x2e2   : > { %s978_s28 = scalar_lea.sflag [#allocation3], %s977_s25 }
 0x2e3   : > { %p1155_p13 = pnand %p1158_p5, %p1345_p6 }
 0x2e5   : > { %p1156_p0 = pneg %p1155_p13 }
 0x2e7   : > { %1254 = dma.done.wait (%p1156_p0), %s978_s28, 512  }
 0x2e8   : > { %1256 = vsyncadd (%p1156_p0), %s978_s28, 4294966784  ;;  %p15_p1 = scmp.ge.s32.totalorder %s1328_s21, 4   ;;  %s1486_s15 = smov %s1263_s16 }
 0x2e9   : > { %s1487_s16 = smov %s1267_s17  ;;  %s1488_s17 = smov %s1339_s24 }
 0x2ea   : > { %s1489_s18 = smov %s1328_s21  ;;  %17 = sbr.rel (!%p15_p1) target bundleno = 3 (0x3), region = 85 }
 0x2ef   :  { %983 = vsyncpa [#allocation3], 1 }
 0x2f0   :  { %985 = vsyncpa [#allocation3 + $0x1], 1 }

</bundles_post_ra>
